<compile_context>
chip_gen: v7x
topology: tpu7x:2x2x1
jax: 0.10.0
libtpu: 0.0.40
codegen_flags: <defaults>
</compile_context>

<pallas_src>
import functools

import jax
import jax.numpy as jnp
from jax.experimental import pallas as pl
from jax.experimental.pallas import tpu as pltpu

ALPHA = 2.0
BETA = 4.0
HEATMAP_LOSS_WEIGHT = 1.0
OFFSET_LOSS_WEIGHT = 1.0
WH_LOSS_WEIGHT = 0.1
MIN_OVERLAP = 0.7
MAX_OBJECT_NUM = 100


# --------------------------------------------------------------------------
# Kernel 1: heatmap target drawing (per-image gaussians, max-accumulated)
# --------------------------------------------------------------------------
def _heatmap_target_kernel(counts_ref, cls_ref, cx_ref, cy_ref, rad_ref,
                           out_ref):
    # counts: (B,) i32 SMEM ; cls/cx/cy: (B, M) i32 SMEM ; rad: (B, M) f32 SMEM
    # out_ref: (C, H, W) f32 VMEM block for image b.
    b = pl.program_id(0)
    _, H, W = out_ref.shape
    out_ref[...] = jnp.zeros_like(out_ref)
    yy = jax.lax.broadcasted_iota(jnp.int32, (H, W), 0)
    xx = jax.lax.broadcasted_iota(jnp.int32, (H, W), 1)

    def draw(m, carry):
        cx = cx_ref[b, m]
        cy = cy_ref[b, m]
        cls_idx = cls_ref[b, m]
        rad = rad_ref[b, m]
        dx = (xx - cx).astype(jnp.float32)
        dy = (yy - cy).astype(jnp.float32)
        sigma = (2.0 * rad + 1.0) / 6.0
        inv_two_sigma_sq = 1.0 / (2.0 * sigma * sigma)
        g = jnp.exp(-(dx * dx + dy * dy) * inv_two_sigma_sq)
        in_patch = jnp.logical_and(jnp.abs(dx) <= rad, jnp.abs(dy) <= rad)
        g = jnp.where(in_patch, g, 0.0)
        # dynamic first-axis index: max-accumulate into this object's class row
        out_ref[cls_idx] = jnp.maximum(out_ref[cls_idx], g)
        return carry

    # loop only over the true (compacted) object count of this image
    jax.lax.fori_loop(0, counts_ref[b], draw, 0)


def _heatmap_targets_pallas(cls_i, cx_i, cy_i, radius, valid, num_classes, H, W):
    B, _ = cls_i.shape
    # compact valid objects to the front so the in-kernel loop trip count is
    # the true per-image object count (order is irrelevant under max)
    order = jnp.argsort(jnp.logical_not(valid).astype(jnp.int32), axis=1)
    take = lambda a: jnp.take_along_axis(a, order, axis=1)
    counts = jnp.sum(valid, axis=1).astype(jnp.int32)

    smem_specs = [pl.BlockSpec(memory_space=pltpu.MemorySpace.SMEM)
                  for _ in range(5)]
    return pl.pallas_call(
        _heatmap_target_kernel,
        out_shape=jax.ShapeDtypeStruct((B, num_classes, H, W), jnp.float32),
        grid=(B,),
        in_specs=smem_specs,
        out_specs=pl.BlockSpec((None, num_classes, H, W),
                               lambda b: (b, 0, 0, 0)),
        compiler_params=pltpu.CompilerParams(
            dimension_semantics=("parallel",),
            vmem_limit_bytes=32 * 1024 * 1024),
    )(counts, take(cls_i), take(cx_i), take(cy_i), take(radius))


# --------------------------------------------------------------------------
# Kernel 2: heatmap focal loss (memory-bound streaming reduction)
# --------------------------------------------------------------------------
def _heatmap_focal_kernel(pred_ref, tgt_ref, out_ref, *, rows_total,
                          block_rows, needs_mask):
    # pred/tgt block: (block_rows, HW) ; out block: (1, 1, 128) f32
    p = pred_ref[...].astype(jnp.float32)          # bf16 inputs upcast here
    p = jnp.clip(p, 0.0001, 1.0 - 0.0001)
    t = tgt_ref[...]                               # f32 targets (exact 1.0 pos)
    is_pos = t == 1.0
    one_minus_p = 1.0 - p
    # single transcendental per element: log(p) on positives, log(1-p) on negs
    logv = jnp.log(jnp.where(is_pos, p, one_minus_p))
    one_minus_t = 1.0 - t
    t2 = one_minus_t * one_minus_t
    w = jnp.where(is_pos,
                  one_minus_p * one_minus_p,       # (1 - p)^2  (alpha = 2)
                  (p * p) * (t2 * t2))             # p^2 (1 - t)^4  (beta = 4)
    loss = logv * w                                # negate once at the sum
    pos = is_pos
    if needs_mask:
        # ragged tail handled in-kernel (select, so NaN garbage never leaks)
        rid = pl.program_id(0) * block_rows + jax.lax.broadcasted_iota(
            jnp.int32, p.shape, 0)
        row_valid = rid < rows_total
        loss = jnp.where(row_valid, loss, 0.0)
        pos = jnp.logical_and(pos, row_valid)
    total = -jnp.sum(loss)
    pos_count = jnp.sum(pos.astype(jnp.float32))
    lane = jax.lax.broadcasted_iota(jnp.int32, out_ref.shape, 2)
    out_ref[...] = jnp.where(lane == 0, total,
                             jnp.where(lane == 1, pos_count, 0.0))


def _heatmap_loss_pallas(pred2d, tgt2d):
    R, HW = pred2d.shape
    # ~4 MiB per input block (2 inputs x 2 buffers ~= 16 MiB in flight)
    rows_cap = max(8, ((4 * 1024 * 1024) // (HW * 4)) // 8 * 8)
    if R <= rows_cap:
        block_rows, n_blocks = R, 1                # full-extent block is legal
    else:
        block_rows = rows_cap
        n_blocks = pl.cdiv(R, block_rows)
        if n_blocks % 2 == 1:
            # prefer an even block count so the "parallel" row grid balances
            # across the two TensorCores on v7x
            block_rows = max(8, (pl.cdiv(R, n_blocks + 1) + 7) // 8 * 8)
            n_blocks = pl.cdiv(R, block_rows)
    needs_mask = (n_blocks * block_rows) != R

    kernel = functools.partial(_heatmap_focal_kernel, rows_total=R,
                               block_rows=block_rows, needs_mask=needs_mask)
    out = pl.pallas_call(
        kernel,
        out_shape=jax.ShapeDtypeStruct((n_blocks, 1, 128), jnp.float32),
        grid=(n_blocks,),
        in_specs=[pl.BlockSpec((block_rows, HW), lambda i: (i, 0)),
                  pl.BlockSpec((block_rows, HW), lambda i: (i, 0))],
        out_specs=pl.BlockSpec((1, 1, 128), lambda i: (i, 0, 0)),
        compiler_params=pltpu.CompilerParams(
            dimension_semantics=("parallel",),
            vmem_limit_bytes=32 * 1024 * 1024),
    )(pred2d, tgt2d)

    partial = jnp.sum(out[:, 0, :], axis=0)        # (128,)
    total, pos = partial[0], partial[1]
    return jnp.where(pos == 0.0, 0.0, total / jnp.maximum(pos, 1.0))


# --------------------------------------------------------------------------
# Kernel 3: fused offset + wh smooth-L1 with a two-stage one-hot gather
# --------------------------------------------------------------------------
def _reg_fused_kernel(off_ref, wh_ref, idxh_ref, idxw_ref, tgt_ref, mask_ref,
                      out_ref, *, h_chunk):
    # off/wh: (1, 2, hc, W); idx_h/idx_w: (1, 1, Mp) i32; tgt: (1, 4, Mp) f32;
    # mask: (1, 1, Mp) f32; out: (1, 1, 1, 128) f32.
    hc = off_ref.shape[2]
    W = off_ref.shape[3]
    Mp = idxh_ref.shape[2]
    hj = pl.program_id(1)
    h0 = hj * h_chunk

    idx_h = idxh_ref[0]                                         # (1, Mp)
    idx_w = idxw_ref[0]                                         # (1, Mp)
    tgt = tgt_ref[0]                                            # (4, Mp)
    mask = mask_ref[0]                                          # (1, Mp)

    # Column one-hot: selects x = idx_w[m] on the MXU (exact 0/1 in f32).
    w_iota = jax.lax.broadcasted_iota(jnp.int32, (W, Mp), 0)
    col_onehot = (w_iota == idx_w).astype(jnp.float32)          # (W, Mp)
    # Row selector: picks y = idx_h[m] on the VPU; the positive-object mask is
    # folded in so padded / invalid objects contribute exactly zero.
    h_iota = jax.lax.broadcasted_iota(jnp.int32, (hc, Mp), 0) + h0
    row_sel = (h_iota == idx_h).astype(jnp.float32) * mask      # (hc, Mp)
    in_chunk = jnp.logical_and(idx_h >= h0, idx_h < h0 + hc)
    obj_mask = mask * in_chunk.astype(jnp.float32)              # (1, Mp)

    factor = 1.0 / 9.0
    sums = []
    for ref, ch in ((off_ref, 0), (off_ref, 1), (wh_ref, 0), (wh_ref, 1)):
        head = ref[0, ch].astype(jnp.float32)                   # (hc, W)
        pc = jnp.dot(head, col_onehot,
                     preferred_element_type=jnp.float32)        # (hc, Mp)
        gathered = jnp.sum(pc * row_sel, axis=0, keepdims=True)  # (1, Mp)
        c = len(sums)
        x = jnp.abs(gathered - tgt[c:c + 1, :] * obj_mask)
        loss = jnp.where(x >= factor, x - 0.5 * factor,
                         (0.5 / factor) * x * x)
        sums.append(jnp.sum(loss))

    off_sum = sums[0] + sums[1]
    wh_sum = sums[2] + sums[3]
    pos = jnp.where(hj == 0, jnp.sum(mask), 0.0)   # count positives once

    lane = jax.lax.broadcasted_iota(jnp.int32, out_ref.shape, 3)
    out_ref[...] = jnp.where(lane == 0, off_sum,
                             jnp.where(lane == 1, wh_sum,
                                       jnp.where(lane == 2, pos, 0.0)))


def _reg_fused_loss_pallas(offset_heads, wh_heads, idx_h, idx_w, tgt4, mask):
    B, _, H, W = offset_heads.shape
    Mp = idx_h.shape[-1]
    # Second "parallel" grid axis over H chunks so both v7x TensorCores stay
    # busy when the batch alone cannot (B == 1).
    n_hchunks = 2 if (B < 2 and H % 16 == 0 and H >= 16) else 1
    hc = H // n_hchunks

    kernel = functools.partial(_reg_fused_kernel, h_chunk=hc)
    out = pl.pallas_call(
        kernel,
        out_shape=jax.ShapeDtypeStruct((B, n_hchunks, 1, 128), jnp.float32),
        grid=(B, n_hchunks),
        in_specs=[pl.BlockSpec((1, 2, hc, W), lambda b, h: (b, 0, h, 0)),
                  pl.BlockSpec((1, 2, hc, W), lambda b, h: (b, 0, h, 0)),
                  pl.BlockSpec((1, 1, Mp), lambda b, h: (b, 0, 0)),
                  pl.BlockSpec((1, 1, Mp), lambda b, h: (b, 0, 0)),
                  pl.BlockSpec((1, 4, Mp), lambda b, h: (b, 0, 0)),
                  pl.BlockSpec((1, 1, Mp), lambda b, h: (b, 0, 0))],
        out_specs=pl.BlockSpec((1, 1, 1, 128), lambda b, h: (b, h, 0, 0)),
        compiler_params=pltpu.CompilerParams(
            dimension_semantics=("parallel", "parallel")),
    )(offset_heads, wh_heads, idx_h, idx_w, tgt4, mask)

    s = jnp.sum(out, axis=(0, 1, 2))               # (128,)
    off_sum, wh_sum, pos = s[0], s[1], s[2]
    denom = jnp.maximum(pos, 1.0)
    offset_loss = jnp.where(pos == 0.0, 0.0, off_sum / denom)
    wh_loss = jnp.where(pos == 0.0, 0.0, wh_sum / denom)
    return offset_loss, wh_loss


# --------------------------------------------------------------------------
# Per-object scalar prep (tiny (B, M) elementwise math, stays in plain JAX)
# --------------------------------------------------------------------------
def _object_params(annotations, num_classes, H, W):
    cls = annotations[..., 4]
    valid = cls >= 0.0
    validf = valid.astype(jnp.float32)
    boxes = annotations[..., 0:4] / 4.0
    x1 = jnp.clip(boxes[..., 0], 0.0, W - 1.0)
    y1 = jnp.clip(boxes[..., 1], 0.0, H - 1.0)
    x2 = jnp.clip(boxes[..., 2], 0.0, W - 1.0)
    y2 = jnp.clip(boxes[..., 3], 0.0, H - 1.0)
    all_h = y2 - y1
    all_w = x2 - x1
    wh_t = jnp.stack([all_w, all_h], axis=-1) * validf[..., None]

    cx = (x1 + x2) * 0.5
    cy = (y1 + y2) * 0.5
    cx_int = jnp.trunc(cx)
    cy_int = jnp.trunc(cy)
    off_t = jnp.stack([cx - cx_int, cy - cy_int], axis=-1) * validf[..., None]
    cx_i = cx_int.astype(jnp.int32)
    cy_i = cy_int.astype(jnp.int32)
    idx_w = jnp.where(valid, cx_i, 0)
    idx_h = jnp.where(valid, cy_i, 0)

    # gaussian radius (same three quadratics as the PyTorch reference)
    hh = jnp.ceil(all_h)
    ww = jnp.ceil(all_w)
    b1 = hh + ww
    c1 = ww * hh * (1.0 - MIN_OVERLAP) / (1.0 + MIN_OVERLAP)
    r1 = (b1 + jnp.sqrt(jnp.maximum(b1 * b1 - 4.0 * c1, 0.0))) / 2.0
    b2 = 2.0 * (hh + ww)
    c2 = (1.0 - MIN_OVERLAP) * ww * hh
    r2 = (b2 + jnp.sqrt(jnp.maximum(b2 * b2 - 16.0 * c2, 0.0))) / 2.0
    a3 = 4.0 * MIN_OVERLAP
    b3 = -2.0 * MIN_OVERLAP * (hh + ww)
    c3 = (MIN_OVERLAP - 1.0) * ww * hh
    r3 = (b3 + jnp.sqrt(jnp.maximum(b3 * b3 - 4.0 * a3 * c3, 0.0))) / 2.0
    radius = jnp.minimum(jnp.minimum(r1, r2), r3)
    radius = jnp.maximum(0.0, jnp.trunc(radius)).astype(jnp.float32)

    cls_i = jnp.clip(jnp.where(valid, cls, 0.0), 0.0,
                     float(num_classes - 1)).astype(jnp.int32)

    return {'valid': valid, 'validf': validf, 'wh_t': wh_t, 'off_t': off_t,
            'idx_h': idx_h, 'idx_w': idx_w, 'cx_i': cx_i, 'cy_i': cy_i,
            'radius': radius, 'cls_i': cls_i}


# --------------------------------------------------------------------------
# Forward pass
# --------------------------------------------------------------------------
def centernet_loss(heatmap_heads, offset_heads, wh_heads, annotations):
    B, num_classes, H, W = heatmap_heads.shape
    HW = H * W
    M = annotations.shape[1]

    p = _object_params(annotations.astype(jnp.float32), num_classes, H, W)

    # Heatmap targets drawn entirely inside a Pallas kernel (grid over B).
    hm_tgt = _heatmap_targets_pallas(p['cls_i'], p['cx_i'], p['cy_i'],
                                     p['radius'], p['valid'],
                                     num_classes, H, W)

    # Focal loss: full-sum reduction is order independent, so the NCHW
    # flattening matches torch's permute(0,2,3,1).view(B,-1,C) layout.
    # pred stays in its native dtype (upcast in-kernel).
    pred_hm = heatmap_heads.reshape(B * num_classes, HW)
    tgt_hm = hm_tgt.reshape(B * num_classes, HW)
    heatmap_loss = HEATMAP_LOSS_WEIGHT * _heatmap_loss_pallas(pred_hm, tgt_hm)

    # Offset / wh heads kept in native NCHW; per-object targets padded to a
    # lane-dense Mp axis.  Indices split into (row, col) for the two-stage
    # gather; kept in int32 end-to-end.
    Mp = ((M + 127) // 128) * 128
    pad_m = Mp - M
    off_t = jnp.transpose(p['off_t'], (0, 2, 1))           # (B, 2, M)
    wh_t = jnp.transpose(p['wh_t'], (0, 2, 1))             # (B, 2, M)
    tgt4 = jnp.concatenate([off_t, wh_t], axis=1).astype(jnp.float32)
    tgt4 = jnp.pad(tgt4, ((0, 0), (0, 0), (0, pad_m)))     # (B, 4, Mp)
    idx_h = jnp.pad(p['idx_h'], ((0, 0), (0, pad_m))).reshape(B, 1, Mp)
    idx_w = jnp.pad(p['idx_w'], ((0, 0), (0, pad_m))).reshape(B, 1, Mp)
    mask = jnp.pad(p['validf'], ((0, 0), (0, pad_m))).reshape(B, 1, Mp)

    offset_loss, wh_loss = _reg_fused_loss_pallas(
        offset_heads, wh_heads, idx_h, idx_w, tgt4, mask)
    offset_loss = OFFSET_LOSS_WEIGHT * offset_loss
    wh_loss = WH_LOSS_WEIGHT * wh_loss

    return {'heatmap_loss': heatmap_loss,
            'offset_loss': offset_loss,
            'wh_loss': wh_loss}


if __name__ == "__main__":
    key = jax.random.PRNGKey(0)
    B, C, H, W = 2, 4, 16, 16   # feature-map shapes (input image would be 64x64)

    k1, k2, k3 = jax.random.split(key, 3)
    heatmap_heads = jax.nn.sigmoid(jax.random.normal(k1, (B, C, H, W),
                                                     dtype=jnp.float32))
    offset_heads = jax.nn.sigmoid(jax.random.normal(k2, (B, 2, H, W),
                                                    dtype=jnp.float32))
    wh_heads = jnp.abs(jax.random.normal(k3, (B, 2, H, W),
                                         dtype=jnp.float32)) * 8.0

    # annotations in input-image coordinates (stride 4), padded with -1 rows
    neg_row = [-1.0, -1.0, -1.0, -1.0, -1.0]
    img0 = [[8.0, 8.0, 40.0, 48.0, 0.0],
            [20.0, 12.0, 56.0, 44.0, 2.0],
            [0.0, 0.0, 16.0, 16.0, 1.0]]
    img1 = [[10.0, 20.0, 50.0, 60.0, 3.0],
            [30.0, 5.0, 60.0, 35.0, 1.0]]

    def pad(rows):
        return rows + [neg_row] * (MAX_OBJECT_NUM - len(rows))

    annotations = jnp.array([pad(img0), pad(img1)], dtype=jnp.float32)

    loss_fn = jax.jit(centernet_loss)
    losses = loss_fn(heatmap_heads, offset_heads, wh_heads, annotations)
    losses = jax.block_until_ready(losses)
    print("KERNEL_OK")
</pallas_src>

<mosaic_0001>
module attributes {stable_mosaic.version = 11 : i64} {
  func.func @_reg_fused_kernel(%arg0: i32, %arg1: i32, %arg2: memref<1x2x16x16xf32, #tpu.memory_space<vmem>>, %arg3: memref<1x2x16x16xf32, #tpu.memory_space<vmem>>, %arg4: memref<1x1x128xi32, #tpu.memory_space<vmem>>, %arg5: memref<1x1x128xi32, #tpu.memory_space<vmem>>, %arg6: memref<1x4x128xf32, #tpu.memory_space<vmem>>, %arg7: memref<1x1x128xf32, #tpu.memory_space<vmem>>, %arg8: memref<1x1x1x128xf32, #tpu.memory_space<vmem>>) attributes {dimension_semantics = [#tpu.dimension_semantics<parallel>, #tpu.dimension_semantics<parallel>], iteration_bounds = array<i64: 2, 1>, scalar_prefetch = 0 : i64, scratch_operands = 0 : i64, tpu.core_type = #tpu.core_type<tc>, window_params = [{transform_indices = @transform_0, window_bounds = array<i64: 1, 2, 16, 16>}, {transform_indices = @transform_1, window_bounds = array<i64: 1, 2, 16, 16>}, {transform_indices = @transform_2, window_bounds = array<i64: 1, 1, 128>}, {transform_indices = @transform_3, window_bounds = array<i64: 1, 1, 128>}, {transform_indices = @transform_4, window_bounds = array<i64: 1, 4, 128>}, {transform_indices = @transform_5, window_bounds = array<i64: 1, 1, 128>}, {transform_indices = @transform_6, window_bounds = array<i64: 1, 1, 1, 128>}]} {
    %c16_i32 = arith.constant 16 : i32
    %0 = arith.muli %arg1, %c16_i32 : i32
    %c0 = arith.constant 0 : index
    %c0_0 = arith.constant 0 : index
    %c0_1 = arith.constant 0 : index
    %1 = vector.load %arg4[%c0, %c0_0, %c0_1] : memref<1x1x128xi32, #tpu.memory_space<vmem>>, vector<1x1x128xi32>
    %2 = vector.shape_cast %1 : vector<1x1x128xi32> to vector<1x128xi32>
    %c0_2 = arith.constant 0 : index
    %c0_3 = arith.constant 0 : index
    %c0_4 = arith.constant 0 : index
    %3 = vector.load %arg5[%c0_2, %c0_3, %c0_4] : memref<1x1x128xi32, #tpu.memory_space<vmem>>, vector<1x1x128xi32>
    %4 = vector.shape_cast %3 : vector<1x1x128xi32> to vector<1x128xi32>
    %c0_5 = arith.constant 0 : index
    %c0_6 = arith.constant 0 : index
    %c0_7 = arith.constant 0 : index
    %5 = vector.load %arg6[%c0_5, %c0_6, %c0_7] : memref<1x4x128xf32, #tpu.memory_space<vmem>>, vector<1x4x128xf32>
    %6 = vector.shape_cast %5 : vector<1x4x128xf32> to vector<4x128xf32>
    %c0_8 = arith.constant 0 : index
    %c0_9 = arith.constant 0 : index
    %c0_10 = arith.constant 0 : index
    %7 = vector.load %arg7[%c0_8, %c0_9, %c0_10] : memref<1x1x128xf32, #tpu.memory_space<vmem>>, vector<1x1x128xf32>
    %8 = vector.shape_cast %7 : vector<1x1x128xf32> to vector<1x128xf32>
    %9 = tpu.iota {dimensions = array<i32: 0>} : vector<16x128xi32>
    %10 = vector.broadcast %4 : vector<1x128xi32> to vector<16x128xi32>
    %11 = arith.cmpi eq, %9, %10 : vector<16x128xi32>
    %12 = arith.extui %11 : vector<16x128xi1> to vector<16x128xi32>
    %13 = arith.sitofp %12 : vector<16x128xi32> to vector<16x128xf32>
    %14 = tpu.iota {dimensions = array<i32: 0>} : vector<16x128xi32>
    %15 = vector.broadcast %0 : i32 to vector<16x128xi32>
    %16 = arith.addi %14, %15 : vector<16x128xi32>
    %17 = vector.broadcast %2 : vector<1x128xi32> to vector<16x128xi32>
    %18 = arith.cmpi eq, %16, %17 : vector<16x128xi32>
    %19 = arith.extui %18 : vector<16x128xi1> to vector<16x128xi32>
    %20 = arith.sitofp %19 : vector<16x128xi32> to vector<16x128xf32>
    %21 = vector.broadcast %8 : vector<1x128xf32> to vector<16x128xf32>
    %22 = arith.mulf %20, %21 : vector<16x128xf32>
    %23 = vector.broadcast %0 : i32 to vector<1x128xi32>
    %24 = arith.cmpi sge, %2, %23 : vector<1x128xi32>
    %c16_i32_11 = arith.constant 16 : i32
    %25 = arith.addi %0, %c16_i32_11 : i32
    %26 = vector.broadcast %25 : i32 to vector<1x128xi32>
    %27 = arith.cmpi slt, %2, %26 : vector<1x128xi32>
    %28 = arith.andi %24, %27 : vector<1x128xi1>
    %29 = arith.extui %28 : vector<1x128xi1> to vector<1x128xi32>
    %30 = arith.sitofp %29 : vector<1x128xi32> to vector<1x128xf32>
    %31 = arith.mulf %8, %30 : vector<1x128xf32>
    %c0_12 = arith.constant 0 : index
    %c0_13 = arith.constant 0 : index
    %c0_14 = arith.constant 0 : index
    %c0_15 = arith.constant 0 : index
    %32 = vector.load %arg2[%c0_12, %c0_13, %c0_14, %c0_15] : memref<1x2x16x16xf32, #tpu.memory_space<vmem>>, vector<1x1x16x16xf32>
    %33 = vector.shape_cast %32 : vector<1x1x16x16xf32> to vector<16x16xf32>
    %cst = arith.constant dense<0.000000e+00> : vector<16x128xf32>
    %34 = tpu.matmul %33, %13, %cst {dimension_numbers = #tpu.dot_dimension_numbers<[1], [0], [0], [1], [0, 0, 1, 1], [], []>} : vector<16x16xf32>, vector<16x128xf32>, vector<16x128xf32> -> vector<16x128xf32>
    %35 = arith.mulf %34, %22 : vector<16x128xf32>
    %cst_16 = arith.constant dense<0.000000e+00> : vector<128xf32>
    %36 = vector.multi_reduction <add>, %35, %cst_16 [0] : vector<16x128xf32> to vector<128xf32>
    %37 = vector.shape_cast %36 : vector<128xf32> to vector<1x128xf32>
    %38 = vector.extract_strided_slice %6 {offsets = [0, 0], sizes = [1, 128], strides = [1, 1]} : vector<4x128xf32> to vector<1x128xf32>
    %39 = arith.mulf %38, %31 : vector<1x128xf32>
    %40 = arith.subf %37, %39 : vector<1x128xf32>
    %41 = math.absf %40 : vector<1x128xf32>
    %cst_17 = arith.constant 0.111111112 : f32
    %42 = vector.broadcast %cst_17 : f32 to vector<1x128xf32>
    %43 = arith.cmpf oge, %41, %42 : vector<1x128xf32>
    %cst_18 = arith.constant 0.055555556 : f32
    %44 = vector.broadcast %cst_18 : f32 to vector<1x128xf32>
    %45 = arith.subf %41, %44 : vector<1x128xf32>
    %cst_19 = arith.constant 4.500000e+00 : f32
    %46 = vector.broadcast %cst_19 : f32 to vector<1x128xf32>
    %47 = arith.mulf %46, %41 : vector<1x128xf32>
    %48 = arith.mulf %47, %41 : vector<1x128xf32>
    %49 = arith.select %43, %45, %48 : vector<1x128xi1>, vector<1x128xf32>
    %50 = vector.shape_cast %49 : vector<1x128xf32> to vector<1x1x128xf32>
    %cst_20 = arith.constant dense<0.000000e+00> : vector<1xf32>
    %51 = vector.multi_reduction <add>, %50, %cst_20 [1, 2] : vector<1x1x128xf32> to vector<1xf32>
    %52 = vector.shape_cast %51 : vector<1xf32> to vector<1x1x1xf32>
    %53 = vector.extract %52[0, 0, 0] : f32 from vector<1x1x1xf32>
    %c0_21 = arith.constant 0 : index
    %c1 = arith.constant 1 : index
    %c0_22 = arith.constant 0 : index
    %c0_23 = arith.constant 0 : index
    %54 = vector.load %arg2[%c0_21, %c1, %c0_22, %c0_23] : memref<1x2x16x16xf32, #tpu.memory_space<vmem>>, vector<1x1x16x16xf32>
    %55 = vector.shape_cast %54 : vector<1x1x16x16xf32> to vector<16x16xf32>
    %cst_24 = arith.constant dense<0.000000e+00> : vector<16x128xf32>
    %56 = tpu.matmul %55, %13, %cst_24 {dimension_numbers = #tpu.dot_dimension_numbers<[1], [0], [0], [1], [0, 0, 1, 1], [], []>} : vector<16x16xf32>, vector<16x128xf32>, vector<16x128xf32> -> vector<16x128xf32>
    %57 = arith.mulf %56, %22 : vector<16x128xf32>
    %cst_25 = arith.constant dense<0.000000e+00> : vector<128xf32>
    %58 = vector.multi_reduction <add>, %57, %cst_25 [0] : vector<16x128xf32> to vector<128xf32>
    %59 = vector.shape_cast %58 : vector<128xf32> to vector<1x128xf32>
    %60 = vector.extract_strided_slice %6 {offsets = [1, 0], sizes = [1, 128], strides = [1, 1]} : vector<4x128xf32> to vector<1x128xf32>
    %61 = arith.mulf %60, %31 : vector<1x128xf32>
    %62 = arith.subf %59, %61 : vector<1x128xf32>
    %63 = math.absf %62 : vector<1x128xf32>
    %cst_26 = arith.constant 0.111111112 : f32
    %64 = vector.broadcast %cst_26 : f32 to vector<1x128xf32>
    %65 = arith.cmpf oge, %63, %64 : vector<1x128xf32>
    %cst_27 = arith.constant 0.055555556 : f32
    %66 = vector.broadcast %cst_27 : f32 to vector<1x128xf32>
    %67 = arith.subf %63, %66 : vector<1x128xf32>
    %cst_28 = arith.constant 4.500000e+00 : f32
    %68 = vector.broadcast %cst_28 : f32 to vector<1x128xf32>
    %69 = arith.mulf %68, %63 : vector<1x128xf32>
    %70 = arith.mulf %69, %63 : vector<1x128xf32>
    %71 = arith.select %65, %67, %70 : vector<1x128xi1>, vector<1x128xf32>
    %72 = vector.shape_cast %71 : vector<1x128xf32> to vector<1x1x128xf32>
    %cst_29 = arith.constant dense<0.000000e+00> : vector<1xf32>
    %73 = vector.multi_reduction <add>, %72, %cst_29 [1, 2] : vector<1x1x128xf32> to vector<1xf32>
    %74 = vector.shape_cast %73 : vector<1xf32> to vector<1x1x1xf32>
    %75 = vector.extract %74[0, 0, 0] : f32 from vector<1x1x1xf32>
    %c0_30 = arith.constant 0 : index
    %c0_31 = arith.constant 0 : index
    %c0_32 = arith.constant 0 : index
    %c0_33 = arith.constant 0 : index
    %76 = vector.load %arg3[%c0_30, %c0_31, %c0_32, %c0_33] : memref<1x2x16x16xf32, #tpu.memory_space<vmem>>, vector<1x1x16x16xf32>
    %77 = vector.shape_cast %76 : vector<1x1x16x16xf32> to vector<16x16xf32>
    %cst_34 = arith.constant dense<0.000000e+00> : vector<16x128xf32>
    %78 = tpu.matmul %77, %13, %cst_34 {dimension_numbers = #tpu.dot_dimension_numbers<[1], [0], [0], [1], [0, 0, 1, 1], [], []>} : vector<16x16xf32>, vector<16x128xf32>, vector<16x128xf32> -> vector<16x128xf32>
    %79 = arith.mulf %78, %22 : vector<16x128xf32>
    %cst_35 = arith.constant dense<0.000000e+00> : vector<128xf32>
    %80 = vector.multi_reduction <add>, %79, %cst_35 [0] : vector<16x128xf32> to vector<128xf32>
    %81 = vector.shape_cast %80 : vector<128xf32> to vector<1x128xf32>
    %82 = vector.extract_strided_slice %6 {offsets = [2, 0], sizes = [1, 128], strides = [1, 1]} : vector<4x128xf32> to vector<1x128xf32>
    %83 = arith.mulf %82, %31 : vector<1x128xf32>
    %84 = arith.subf %81, %83 : vector<1x128xf32>
    %85 = math.absf %84 : vector<1x128xf32>
    %cst_36 = arith.constant 0.111111112 : f32
    %86 = vector.broadcast %cst_36 : f32 to vector<1x128xf32>
    %87 = arith.cmpf oge, %85, %86 : vector<1x128xf32>
    %cst_37 = arith.constant 0.055555556 : f32
    %88 = vector.broadcast %cst_37 : f32 to vector<1x128xf32>
    %89 = arith.subf %85, %88 : vector<1x128xf32>
    %cst_38 = arith.constant 4.500000e+00 : f32
    %90 = vector.broadcast %cst_38 : f32 to vector<1x128xf32>
    %91 = arith.mulf %90, %85 : vector<1x128xf32>
    %92 = arith.mulf %91, %85 : vector<1x128xf32>
    %93 = arith.select %87, %89, %92 : vector<1x128xi1>, vector<1x128xf32>
    %94 = vector.shape_cast %93 : vector<1x128xf32> to vector<1x1x128xf32>
    %cst_39 = arith.constant dense<0.000000e+00> : vector<1xf32>
    %95 = vector.multi_reduction <add>, %94, %cst_39 [1, 2] : vector<1x1x128xf32> to vector<1xf32>
    %96 = vector.shape_cast %95 : vector<1xf32> to vector<1x1x1xf32>
    %97 = vector.extract %96[0, 0, 0] : f32 from vector<1x1x1xf32>
    %c0_40 = arith.constant 0 : index
    %c1_41 = arith.constant 1 : index
    %c0_42 = arith.constant 0 : index
    %c0_43 = arith.constant 0 : index
    %98 = vector.load %arg3[%c0_40, %c1_41, %c0_42, %c0_43] : memref<1x2x16x16xf32, #tpu.memory_space<vmem>>, vector<1x1x16x16xf32>
    %99 = vector.shape_cast %98 : vector<1x1x16x16xf32> to vector<16x16xf32>
    %cst_44 = arith.constant dense<0.000000e+00> : vector<16x128xf32>
    %100 = tpu.matmul %99, %13, %cst_44 {dimension_numbers = #tpu.dot_dimension_numbers<[1], [0], [0], [1], [0, 0, 1, 1], [], []>} : vector<16x16xf32>, vector<16x128xf32>, vector<16x128xf32> -> vector<16x128xf32>
    %101 = arith.mulf %100, %22 : vector<16x128xf32>
    %cst_45 = arith.constant dense<0.000000e+00> : vector<128xf32>
    %102 = vector.multi_reduction <add>, %101, %cst_45 [0] : vector<16x128xf32> to vector<128xf32>
    %103 = vector.shape_cast %102 : vector<128xf32> to vector<1x128xf32>
    %104 = vector.extract_strided_slice %6 {offsets = [3, 0], sizes = [1, 128], strides = [1, 1]} : vector<4x128xf32> to vector<1x128xf32>
    %105 = arith.mulf %104, %31 : vector<1x128xf32>
    %106 = arith.subf %103, %105 : vector<1x128xf32>
    %107 = math.absf %106 : vector<1x128xf32>
    %cst_46 = arith.constant 0.111111112 : f32
    %108 = vector.broadcast %cst_46 : f32 to vector<1x128xf32>
    %109 = arith.cmpf oge, %107, %108 : vector<1x128xf32>
    %cst_47 = arith.constant 0.055555556 : f32
    %110 = vector.broadcast %cst_47 : f32 to vector<1x128xf32>
    %111 = arith.subf %107, %110 : vector<1x128xf32>
    %cst_48 = arith.constant 4.500000e+00 : f32
    %112 = vector.broadcast %cst_48 : f32 to vector<1x128xf32>
    %113 = arith.mulf %112, %107 : vector<1x128xf32>
    %114 = arith.mulf %113, %107 : vector<1x128xf32>
    %115 = arith.select %109, %111, %114 : vector<1x128xi1>, vector<1x128xf32>
    %116 = vector.shape_cast %115 : vector<1x128xf32> to vector<1x1x128xf32>
    %cst_49 = arith.constant dense<0.000000e+00> : vector<1xf32>
    %117 = vector.multi_reduction <add>, %116, %cst_49 [1, 2] : vector<1x1x128xf32> to vector<1xf32>
    %118 = vector.shape_cast %117 : vector<1xf32> to vector<1x1x1xf32>
    %119 = vector.extract %118[0, 0, 0] : f32 from vector<1x1x1xf32>
    %120 = arith.addf %53, %75 : f32
    %121 = arith.addf %97, %119 : f32
    %c0_i32 = arith.constant 0 : i32
    %122 = arith.cmpi eq, %arg1, %c0_i32 : i32
    %123 = vector.shape_cast %8 : vector<1x128xf32> to vector<1x1x128xf32>
    %cst_50 = arith.constant dense<0.000000e+00> : vector<1xf32>
    %124 = vector.multi_reduction <add>, %123, %cst_50 [1, 2] : vector<1x1x128xf32> to vector<1xf32>
    %125 = vector.shape_cast %124 : vector<1xf32> to vector<1x1x1xf32>
    %126 = vector.extract %125[0, 0, 0] : f32 from vector<1x1x1xf32>
    %cst_51 = arith.constant 0.000000e+00 : f32
    %127 = arith.select %122, %126, %cst_51 : f32
    %128 = tpu.iota {dimensions = array<i32: 3>} : vector<1x1x1x128xi32>
    %c0_i32_52 = arith.constant 0 : i32
    %129 = vector.broadcast %c0_i32_52 : i32 to vector<1x1x1x128xi32>
    %130 = arith.cmpi eq, %128, %129 : vector<1x1x1x128xi32>
    %c1_i32 = arith.constant 1 : i32
    %131 = vector.broadcast %c1_i32 : i32 to vector<1x1x1x128xi32>
    %132 = arith.cmpi eq, %128, %131 : vector<1x1x1x128xi32>
    %c2_i32 = arith.constant 2 : i32
    %133 = vector.broadcast %c2_i32 : i32 to vector<1x1x1x128xi32>
    %134 = arith.cmpi eq, %128, %133 : vector<1x1x1x128xi32>
    %cst_53 = arith.constant 0.000000e+00 : f32
    %135 = vector.broadcast %127 : f32 to vector<1x1x1x128xf32>
    %136 = vector.broadcast %cst_53 : f32 to vector<1x1x1x128xf32>
    %137 = arith.select %134, %135, %136 : vector<1x1x1x128xi1>, vector<1x1x1x128xf32>
    %138 = vector.broadcast %121 : f32 to vector<1x1x1x128xf32>
    %139 = arith.select %132, %138, %137 : vector<1x1x1x128xi1>, vector<1x1x1x128xf32>
    %140 = vector.broadcast %120 : f32 to vector<1x1x1x128xf32>
    %141 = arith.select %130, %140, %139 : vector<1x1x1x128xi1>, vector<1x1x1x128xf32>
    %c0_54 = arith.constant 0 : index
    %c0_55 = arith.constant 0 : index
    %c0_56 = arith.constant 0 : index
    %c0_57 = arith.constant 0 : index
    %142 = vector.load %arg8[%c0_54, %c0_55, %c0_56, %c0_57] : memref<1x1x1x128xf32, #tpu.memory_space<vmem>>, vector<1x1x1x128xf32>
    tpu.vector_store %arg8[%c0_54, %c0_55, %c0_56, %c0_57], %141 {strides = array<i32>} : memref<1x1x1x128xf32, #tpu.memory_space<vmem>>, vector<1x1x1x128xf32>,
    return
  }
  func.func @transform_0(%arg0: i32, %arg1: i32) -> (i32, i32, i32, i32) {
    %c0_i32 = arith.constant 0 : i32
    %c0_i32_0 = arith.constant 0 : i32
    %c0_i32_1 = arith.constant 0 : i32
    return %arg0, %c0_i32, %arg1, %c0_i32_0 : i32, i32, i32, i32
  }
  func.func @transform_1(%arg0: i32, %arg1: i32) -> (i32, i32, i32, i32) {
    %c0_i32 = arith.constant 0 : i32
    %c0_i32_0 = arith.constant 0 : i32
    %c0_i32_1 = arith.constant 0 : i32
    return %arg0, %c0_i32, %arg1, %c0_i32_0 : i32, i32, i32, i32
  }
  func.func @transform_2(%arg0: i32, %arg1: i32) -> (i32, i32, i32) {
    %c0_i32 = arith.constant 0 : i32
    %c0_i32_0 = arith.constant 0 : i32
    %c0_i32_1 = arith.constant 0 : i32
    return %arg0, %c0_i32, %c0_i32_0 : i32, i32, i32
  }
  func.func @transform_3(%arg0: i32, %arg1: i32) -> (i32, i32, i32) {
    %c0_i32 = arith.constant 0 : i32
    %c0_i32_0 = arith.constant 0 : i32
    %c0_i32_1 = arith.constant 0 : i32
    return %arg0, %c0_i32, %c0_i32_0 : i32, i32, i32
  }
  func.func @transform_4(%arg0: i32, %arg1: i32) -> (i32, i32, i32) {
    %c0_i32 = arith.constant 0 : i32
    %c0_i32_0 = arith.constant 0 : i32
    %c0_i32_1 = arith.constant 0 : i32
    return %arg0, %c0_i32, %c0_i32_0 : i32, i32, i32
  }
  func.func @transform_5(%arg0: i32, %arg1: i32) -> (i32, i32, i32) {
    %c0_i32 = arith.constant 0 : i32
    %c0_i32_0 = arith.constant 0 : i32
    %c0_i32_1 = arith.constant 0 : i32
    return %arg0, %c0_i32, %c0_i32_0 : i32, i32, i32
  }
  func.func @transform_6(%arg0: i32, %arg1: i32) -> (i32, i32, i32, i32) {
    %c0_i32 = arith.constant 0 : i32
    %c0_i32_0 = arith.constant 0 : i32
    %c0_i32_1 = arith.constant 0 : i32
    return %arg0, %arg1, %c0_i32, %c0_i32_0 : i32, i32, i32, i32
  }
}

module attributes {stable_mosaic.version = 11 : i64} {
  func.func @_heatmap_target_kernel(%arg0: i32, %arg1: memref<2xi32, #tpu.memory_space<smem>>, %arg2: memref<2x100xi32, #tpu.memory_space<smem>>, %arg3: memref<2x100xi32, #tpu.memory_space<smem>>, %arg4: memref<2x100xi32, #tpu.memory_space<smem>>, %arg5: memref<2x100xf32, #tpu.memory_space<smem>>, %arg6: memref<1x4x16x16xf32, #tpu.memory_space<vmem>>) attributes {dimension_semantics = [#tpu.dimension_semantics<parallel>], iteration_bounds = array<i64: 2>, scalar_prefetch = 0 : i64, scratch_operands = 0 : i64, tpu.core_type = #tpu.core_type<tc>, window_params = [{transform_indices = @transform_0, window_bounds = array<i64: 2>}, {transform_indices = @transform_1, window_bounds = array<i64: 2, 100>}, {transform_indices = @transform_2, window_bounds = array<i64: 2, 100>}, {transform_indices = @transform_3, window_bounds = array<i64: 2, 100>}, {transform_indices = @transform_4, window_bounds = array<i64: 2, 100>}, {transform_indices = @transform_5, window_bounds = array<i64: 1, 4, 16, 16>}]} {
    %cst = arith.constant 0.000000e+00 : f32
    %0 = vector.broadcast %cst : f32 to vector<4x16x16xf32>
    %c0 = arith.constant 0 : index
    %c0_0 = arith.constant 0 : index
    %c0_1 = arith.constant 0 : index
    %c0_2 = arith.constant 0 : index
    %1 = vector.load %arg6[%c0, %c0_0, %c0_1, %c0_2] : memref<1x4x16x16xf32, #tpu.memory_space<vmem>>, vector<1x4x16x16xf32>
    %2 = vector.shape_cast %1 : vector<1x4x16x16xf32> to vector<4x16x16xf32>
    %3 = vector.shape_cast %0 : vector<4x16x16xf32> to vector<1x4x16x16xf32>
    tpu.vector_store %arg6[%c0, %c0_0, %c0_1, %c0_2], %3 {strides = array<i32>} : memref<1x4x16x16xf32, #tpu.memory_space<vmem>>, vector<1x4x16x16xf32>,
    %4 = tpu.iota {dimensions = array<i32: 0>} : vector<16x16xi32>
    %5 = tpu.iota {dimensions = array<i32: 1>} : vector<16x16xi32>
    %6 = arith.index_cast %arg0 : i32 to index
    %7 = memref.load %arg1[%6] : memref<2xi32, #tpu.memory_space<smem>>
    %c0_i32 = arith.constant 0 : i32
    %c0_i32_3 = arith.constant 0 : i32
    %8 = arith.subi %7, %c0_i32_3 : i32
    %9 = arith.addi %c0_i32_3, %8 : i32
    %c1_i32 = arith.constant 1 : i32
    scf.for %arg7 = %c0_i32_3 to %9 step %c1_i32  : i32 {
      %10 = arith.index_cast %arg0 : i32 to index
      %11 = arith.index_cast %arg7 : i32 to index
      %12 = memref.load %arg3[%10, %11] : memref<2x100xi32, #tpu.memory_space<smem>>
      %13 = arith.index_cast %arg0 : i32 to index
      %14 = arith.index_cast %arg7 : i32 to index
      %15 = memref.load %arg4[%13, %14] : memref<2x100xi32, #tpu.memory_space<smem>>
      %16 = arith.index_cast %arg0 : i32 to index
      %17 = arith.index_cast %arg7 : i32 to index
      %18 = memref.load %arg2[%16, %17] : memref<2x100xi32, #tpu.memory_space<smem>>
      %19 = arith.index_cast %arg0 : i32 to index
      %20 = arith.index_cast %arg7 : i32 to index
      %21 = memref.load %arg5[%19, %20] : memref<2x100xf32, #tpu.memory_space<smem>>
      %22 = vector.broadcast %12 : i32 to vector<16x16xi32>
      %23 = arith.subi %5, %22 : vector<16x16xi32>
      %24 = arith.sitofp %23 : vector<16x16xi32> to vector<16x16xf32>
      %25 = vector.broadcast %15 : i32 to vector<16x16xi32>
      %26 = arith.subi %4, %25 : vector<16x16xi32>
      %27 = arith.sitofp %26 : vector<16x16xi32> to vector<16x16xf32>
      %cst_4 = arith.constant 2.000000e+00 : f32
      %28 = arith.mulf %cst_4, %21 : f32
      %cst_5 = arith.constant 1.000000e+00 : f32
      %29 = arith.addf %28, %cst_5 : f32
      %cst_6 = arith.constant 6.000000e+00 : f32
      %30 = arith.divf %29, %cst_6 : f32
      %cst_7 = arith.constant 2.000000e+00 : f32
      %31 = arith.mulf %cst_7, %30 : f32
      %32 = arith.mulf %31, %30 : f32
      %cst_8 = arith.constant 1.000000e+00 : f32
      %33 = arith.divf %cst_8, %32 : f32
      %34 = arith.mulf %24, %24 : vector<16x16xf32>
      %35 = arith.mulf %27, %27 : vector<16x16xf32>
      %36 = arith.addf %34, %35 : vector<16x16xf32>
      %cst_9 = arith.constant 0.000000e+00 : f32
      %37 = vector.broadcast %cst_9 : f32 to vector<16x16xf32>
      %38 = arith.subf %37, %36 : vector<16x16xf32>
      %39 = vector.broadcast %33 : f32 to vector<16x16xf32>
      %40 = arith.mulf %38, %39 : vector<16x16xf32>
      %41 = math.exp %40 : vector<16x16xf32>
      %42 = math.absf %24 : vector<16x16xf32>
      %43 = vector.broadcast %21 : f32 to vector<16x16xf32>
      %44 = arith.cmpf ole, %42, %43 : vector<16x16xf32>
      %45 = math.absf %27 : vector<16x16xf32>
      %46 = vector.broadcast %21 : f32 to vector<16x16xf32>
      %47 = arith.cmpf ole, %45, %46 : vector<16x16xf32>
      %48 = arith.andi %44, %47 : vector<16x16xi1>
      %cst_10 = arith.constant 0.000000e+00 : f32
      %49 = vector.broadcast %cst_10 : f32 to vector<16x16xf32>
      %50 = arith.select %48, %41, %49 : vector<16x16xi1>, vector<16x16xf32>
      %c0_11 = arith.constant 0 : index
      %51 = arith.index_cast %18 : i32 to index
      %c0_12 = arith.constant 0 : index
      %c0_13 = arith.constant 0 : index
      %52 = vector.load %arg6[%c0_11, %51, %c0_12, %c0_13] : memref<1x4x16x16xf32, #tpu.memory_space<vmem>>, vector<1x1x16x16xf32>
      %53 = vector.shape_cast %52 : vector<1x1x16x16xf32> to vector<16x16xf32>
      %54 = arith.maximumf %53, %50 : vector<16x16xf32>
      %c0_14 = arith.constant 0 : index
      %55 = arith.index_cast %18 : i32 to index
      %c0_15 = arith.constant 0 : index
      %c0_16 = arith.constant 0 : index
      %56 = vector.load %arg6[%c0_14, %55, %c0_15, %c0_16] : memref<1x4x16x16xf32, #tpu.memory_space<vmem>>, vector<1x1x16x16xf32>
      %57 = vector.shape_cast %56 : vector<1x1x16x16xf32> to vector<16x16xf32>
      %58 = vector.shape_cast %54 : vector<16x16xf32> to vector<1x1x16x16xf32>
      tpu.vector_store %arg6[%c0_14, %55, %c0_15, %c0_16], %58 {strides = array<i32>} : memref<1x4x16x16xf32, #tpu.memory_space<vmem>>, vector<1x1x16x16xf32>,
    }
    return
  }
  func.func @transform_0(%arg0: i32) -> i32 {
    %c0_i32 = arith.constant 0 : i32
    %c0_i32_0 = arith.constant 0 : i32
    return %c0_i32 : i32
  }
  func.func @transform_1(%arg0: i32) -> (i32, i32) {
    %c0_i32 = arith.constant 0 : i32
    %c0_i32_0 = arith.constant 0 : i32
    %c0_i32_1 = arith.constant 0 : i32
    return %c0_i32, %c0_i32_0 : i32, i32
  }
  func.func @transform_2(%arg0: i32) -> (i32, i32) {
    %c0_i32 = arith.constant 0 : i32
    %c0_i32_0 = arith.constant 0 : i32
    %c0_i32_1 = arith.constant 0 : i32
    return %c0_i32, %c0_i32_0 : i32, i32
  }
  func.func @transform_3(%arg0: i32) -> (i32, i32) {
    %c0_i32 = arith.constant 0 : i32
    %c0_i32_0 = arith.constant 0 : i32
    %c0_i32_1 = arith.constant 0 : i32
    return %c0_i32, %c0_i32_0 : i32, i32
  }
  func.func @transform_4(%arg0: i32) -> (i32, i32) {
    %c0_i32 = arith.constant 0 : i32
    %c0_i32_0 = arith.constant 0 : i32
    %c0_i32_1 = arith.constant 0 : i32
    return %c0_i32, %c0_i32_0 : i32, i32
  }
  func.func @transform_5(%arg0: i32) -> (i32, i32, i32, i32) {
    %c0_i32 = arith.constant 0 : i32
    %c0_i32_0 = arith.constant 0 : i32
    %c0_i32_1 = arith.constant 0 : i32
    %c0_i32_2 = arith.constant 0 : i32
    return %arg0, %c0_i32, %c0_i32_0, %c0_i32_1 : i32, i32, i32, i32
  }
}

module attributes {stable_mosaic.version = 11 : i64} {
  func.func @_heatmap_focal_kernel(%arg0: i32, %arg1: memref<8x256xf32, #tpu.memory_space<vmem>>, %arg2: memref<8x256xf32, #tpu.memory_space<vmem>>, %arg3: memref<1x1x128xf32, #tpu.memory_space<vmem>>) attributes {dimension_semantics = [#tpu.dimension_semantics<parallel>], iteration_bounds = array<i64: 1>, scalar_prefetch = 0 : i64, scratch_operands = 0 : i64, tpu.core_type = #tpu.core_type<tc>, window_params = [{transform_indices = @transform_0, window_bounds = array<i64: 8, 256>}, {transform_indices = @transform_1, window_bounds = array<i64: 8, 256>}, {transform_indices = @transform_2, window_bounds = array<i64: 1, 1, 128>}]} {
    %c0 = arith.constant 0 : index
    %c0_0 = arith.constant 0 : index
    %0 = vector.load %arg1[%c0, %c0_0] : memref<8x256xf32, #tpu.memory_space<vmem>>, vector<8x256xf32>
    %cst = arith.constant 9.99999974E-5 : f32
    %cst_1 = arith.constant 0.999899983 : f32
    %1 = vector.broadcast %cst : f32 to vector<8x256xf32>
    %2 = arith.maximumf %1, %0 : vector<8x256xf32>
    %3 = vector.broadcast %cst_1 : f32 to vector<8x256xf32>
    %4 = arith.minimumf %3, %2 : vector<8x256xf32>
    %c0_2 = arith.constant 0 : index
    %c0_3 = arith.constant 0 : index
    %5 = vector.load %arg2[%c0_2, %c0_3] : memref<8x256xf32, #tpu.memory_space<vmem>>, vector<8x256xf32>
    %cst_4 = arith.constant 1.000000e+00 : f32
    %6 = vector.broadcast %cst_4 : f32 to vector<8x256xf32>
    %7 = arith.cmpf oeq, %5, %6 : vector<8x256xf32>
    %cst_5 = arith.constant 1.000000e+00 : f32
    %8 = vector.broadcast %cst_5 : f32 to vector<8x256xf32>
    %9 = arith.subf %8, %4 : vector<8x256xf32>
    %10 = arith.select %7, %4, %9 : vector<8x256xi1>, vector<8x256xf32>
    %11 = math.log %10 : vector<8x256xf32>
    %cst_6 = arith.constant 1.000000e+00 : f32
    %12 = vector.broadcast %cst_6 : f32 to vector<8x256xf32>
    %13 = arith.subf %12, %5 : vector<8x256xf32>
    %14 = arith.mulf %13, %13 : vector<8x256xf32>
    %15 = arith.mulf %9, %9 : vector<8x256xf32>
    %16 = arith.mulf %4, %4 : vector<8x256xf32>
    %17 = arith.mulf %14, %14 : vector<8x256xf32>
    %18 = arith.mulf %16, %17 : vector<8x256xf32>
    %19 = arith.select %7, %15, %18 : vector<8x256xi1>, vector<8x256xf32>
    %20 = arith.mulf %11, %19 : vector<8x256xf32>
    %21 = vector.shape_cast %20 : vector<8x256xf32> to vector<1x8x256xf32>
    %cst_7 = arith.constant dense<0.000000e+00> : vector<1xf32>
    %22 = vector.multi_reduction <add>, %21, %cst_7 [1, 2] : vector<1x8x256xf32> to vector<1xf32>
    %23 = vector.shape_cast %22 : vector<1xf32> to vector<1x1x1xf32>
    %24 = vector.extract %23[0, 0, 0] : f32 from vector<1x1x1xf32>
    %cst_8 = arith.constant 0.000000e+00 : f32
    %25 = arith.subf %cst_8, %24 : f32
    %26 = arith.extui %7 : vector<8x256xi1> to vector<8x256xi32>
    %27 = arith.sitofp %26 : vector<8x256xi32> to vector<8x256xf32>
    %28 = vector.shape_cast %27 : vector<8x256xf32> to vector<1x8x256xf32>
    %cst_9 = arith.constant dense<0.000000e+00> : vector<1xf32>
    %29 = vector.multi_reduction <add>, %28, %cst_9 [1, 2] : vector<1x8x256xf32> to vector<1xf32>
    %30 = vector.shape_cast %29 : vector<1xf32> to vector<1x1x1xf32>
    %31 = vector.extract %30[0, 0, 0] : f32 from vector<1x1x1xf32>
    %32 = tpu.iota {dimensions = array<i32: 2>} : vector<1x1x128xi32>
    %c0_i32 = arith.constant 0 : i32
    %33 = vector.broadcast %c0_i32 : i32 to vector<1x1x128xi32>
    %34 = arith.cmpi eq, %32, %33 : vector<1x1x128xi32>
    %c1_i32 = arith.constant 1 : i32
    %35 = vector.broadcast %c1_i32 : i32 to vector<1x1x128xi32>
    %36 = arith.cmpi eq, %32, %35 : vector<1x1x128xi32>
    %cst_10 = arith.constant 0.000000e+00 : f32
    %37 = vector.broadcast %31 : f32 to vector<1x1x128xf32>
    %38 = vector.broadcast %cst_10 : f32 to vector<1x1x128xf32>
    %39 = arith.select %36, %37, %38 : vector<1x1x128xi1>, vector<1x1x128xf32>
    %40 = vector.broadcast %25 : f32 to vector<1x1x128xf32>
    %41 = arith.select %34, %40, %39 : vector<1x1x128xi1>, vector<1x1x128xf32>
    %c0_11 = arith.constant 0 : index
    %c0_12 = arith.constant 0 : index
    %c0_13 = arith.constant 0 : index
    %42 = vector.load %arg3[%c0_11, %c0_12, %c0_13] : memref<1x1x128xf32, #tpu.memory_space<vmem>>, vector<1x1x128xf32>
    tpu.vector_store %arg3[%c0_11, %c0_12, %c0_13], %41 {strides = array<i32>} : memref<1x1x128xf32, #tpu.memory_space<vmem>>, vector<1x1x128xf32>,
    return
  }
  func.func @transform_0(%arg0: i32) -> (i32, i32) {
    %c0_i32 = arith.constant 0 : i32
    %c0_i32_0 = arith.constant 0 : i32
    return %arg0, %c0_i32 : i32, i32
  }
  func.func @transform_1(%arg0: i32) -> (i32, i32) {
    %c0_i32 = arith.constant 0 : i32
    %c0_i32_0 = arith.constant 0 : i32
    return %arg0, %c0_i32 : i32, i32
  }
  func.func @transform_2(%arg0: i32) -> (i32, i32, i32) {
    %c0_i32 = arith.constant 0 : i32
    %c0_i32_0 = arith.constant 0 : i32
    %c0_i32_1 = arith.constant 0 : i32
    return %arg0, %c0_i32, %c0_i32_0 : i32, i32, i32
  }
}

</mosaic_0001>

<bundles_post_ra>
// kernel: centernet_loss.5
= control target key start
LH: loop header
LB: loop body
LE: loop exit
PB: predicated region body
PF: predicated region fallthrough
CT: control target
= control target key end

     0   :  { %s1238_s21 = smov 0   ;;  %s1240_s22 = smov 0   ;;  %s1334_s0 = inlined_call_operand.vmem [shape: f32[2,2,16,16], index: 0, kind: input, shape index: {}]   ;;  %s1335_s1 = inlined_call_operand.vmem [shape: f32[2,2,16,16], index: 1, kind: input, shape index: {}]   ;;  %s1336_s2 = inlined_call_operand.vmem [shape: s32[2,1,128], index: 2, kind: input, shape index: {}]   ;;  %s1337_s3 = inlined_call_operand.vmem [shape: s32[2,1,128], index: 3, kind: input, shape index: {}]   ;;  %s1338_s4 = inlined_call_operand.vmem [shape: f32[2,4,128], index: 4, kind: input, shape index: {}]   ;;  %s1339_s5 = inlined_call_operand.vmem [shape: f32[2,1,128], index: 5, kind: input, shape index: {}]   ;;  %s1340_s6 = inlined_call_operand.vmem [shape: f32[2,1,1,128], index: 6, kind: output, shape index: {}]  }
   0x1   :  { %s1242_s23 = smov 0  }
   0x2 LB: > { %s28_s24 = sadd.s32 1, %s1195_s22  ;;  %p1041_p0 = scmp.ge.s32.totalorder %s1199_s23, 1  ;;  %s1199_s23 = sphi %s1242_s23, %s16_s23   ;;  %s1195_s22 = sphi %s1240_s22, %s1344_s22   ;;  %s1191_s21 = sphi %s1238_s21, %s1343_s21  }
   0x3   : > { %p30_p1 = scmp.ge.s32.totalorder %s28_s24, 2  ;;  %p283_p2 = scmp.lt.s32.totalorder %s1199_s23, 3 }
   0x5   : > { %s1346_s24 = smov (%p30_p1, %s28_s24), 0  ;;  %p284_p3 = pnand %p1041_p0, %p283_p2 }
   0x6   : > { %p341_p4 = scmp.lt.s32.totalorder (!%p284_p3), %s1191_s21, 1  ;;  %v384_v0 = vlaneseq (!%p284_p3)  ;;  %vm428_vm0 = vcmask (!%p284_p3), 130048   ;;  %v1201_v7 = vmov (!%p284_p3), 1.0|1.0   ;;  %v1202_v19 = vmov (!%p284_p3), 0.0  }
   0x7   : > { %287 = sbr.rel (%p284_p3) target bundleno = 482 (0x1e2), region = 44  ;;  %vm527_vm9 = vcmask (!%p284_p3), 1040384  }
   0x8   : > { %v385_v1 = vshrl.u32 (!%p284_p3), %v384_v0, 7 }
   0xa   : > { %v386_v2 = vadd.s32 (!%p284_p3), 8, %v385_v1  ;;  %v402_v14 = vsub.s32 (!%p284_p3), 0, %v385_v1 }
   0xe   : > { %s1348_s21 = smov (!%p341_p4, %s1191_s21), 1 }
   0xf   : > { %s365_s27 = scalar_lea.vmem %s1337_s3, %s1348_s21  ;;  %s1079_s28 = sshll.u32 %s1348_s21, 5 }
  0x10   : > { %v1047_v3 = vld [vmem:[%s365_s27] ss:$0 sm:$0xff]  ;;  %s348_s7 = scalar_lea.vmem %s1334_s0, %s1079_s28  ;;  %s358_s10 = scalar_lea.vmem %s1335_s1, %s1079_s28 }
  0x11   : > { %vm391_vm1 = vcmp.eq.s32.totalorder %v385_v1, %v1047_v3  ;;  %vm392_vm2 = vcmp.eq.s32.totalorder %v386_v2, %v1047_v3  ;;  %v426_v4 = vld [vmem:[%s348_s7] sm:$0xff]  ;;  %v1058_v5 = vld [vmem:[%s348_s7 + $0x10] sm:$0xff]  ;;  %v427_v8 = vld [vmem:[%s348_s7 + $0x8] sm:$0xff]  ;;  %s362_s13 = scalar_lea.vmem %s1336_s2, %s1348_s21  ;;  %s372_s16 = scalar_lea.vmem %s1339_s5, %s1348_s21 }
  0x12   : > { %vm1267_vm3 = vmpackc.low %vm392_vm2, %vm391_vm1  ;;  %1101 = vmatprep.mubr.msk.f32.mxu0 %vm428_vm0, %v426_v4  ;;  %1108 = vmatprep.mubr.msk.f32.mxu1 %vm428_vm0, %v1058_v5  ;;  %v1059_v9 = vld [vmem:[%s348_s7 + $0x18] sm:$0xff]  ;;  %v658_v10 = vld [vmem:[%s358_s10] sm:$0xff]  ;;  %s1046_s17 = sshll.u32 %s1348_s21, 2 }
  0x13   : > { %1126 = vmatprep.subr.msk.bf16.mxu0 %vm1267_vm3, %v1201_v7  ;;  %1130 = vmatprep.subr.msk.bf16.mxu1 %vm1267_vm3, %v1201_v7  ;;  %v1070_v11 = vld [vmem:[%s358_s10 + $0x10] sm:$0xff]  ;;  %v659_v12 = vld [vmem:[%s358_s10 + $0x8] sm:$0xff]  ;;  %v1071_v13 = vld [vmem:[%s358_s10 + $0x18] sm:$0xff]  ;;  %s369_s20 = scalar_lea.vmem %s1338_s4, %s1046_s17  ;;  %s378_s10 = scalar_lea.vmem %s1340_s6, %s1348_s21 }
  0x14   : > { %1128 = vmatpush3.bf16.msk.msra.mxu0 %vm1267_vm3, %v1201_v7  ;;  %1132 = vmatpush3.bf16.msk.msra.mxu1 %vm1267_vm3, %v1201_v7  ;;  %v380_v15 = vld [vmem:[%s362_s13] sm:$0x1] }
  0x15   : > { %1134 = vmatprep.subr.msk.bf16.mxu0 %vm1267_vm3, %v1201_v7  ;;  %1138 = vmatprep.subr.msk.bf16.mxu1 %vm1267_vm3, %v1201_v7  ;;  %v403_v16 = vrot.slane %v380_v15, %v402_v14  ;;  %v1306_v17 = vld [vmem:[%s372_s16] sm:$0x1]  ;;  %vm418_vm6 = vcmp.ge.s32.totalorder %v380_v15, 0  ;;  %vm421_vm7 = vcmp.lt.s32.totalorder %v380_v15, 16 }
  0x16   : > { %v414_v18 = vrot.slane %v1306_v17, %v402_v14  ;;  %vm422_vm8 = vmand %vm418_vm6, %vm421_vm7  ;;  %v382_v51 = vld [vmem:[%s369_s20] sm:$0xf] }
  0x17   : > { %1102 = vmatmul.mubr.msk.f32.vlgmr.msra.gmra.mrb[0].mxu0 %vm428_vm0, %v427_v8  ;;  %1109 = vmatmul.mubr.msk.f32.vlgmr.msra.gmra.mrb[0].mxu1 %vm428_vm0, %v1059_v9  ;;  %vm405_vm4 = vcmp.eq.s32.totalorder %v386_v2, %v403_v16  ;;  %vm404_vm5 = vcmp.eq.s32.totalorder %v385_v1, %v403_v16  ;;  %v1052_v30 = vsel %vm422_vm8, 1.0, %v1202_v19 }
  0x18   : > { %1136 = vmatpush3.bf16.msk.msra.mxu0 %vm1267_vm3, %v1201_v7  ;;  %1140 = vmatpush3.bf16.msk.msra.mxu1 %vm1267_vm3, %v1201_v7  ;;  %v1051_v20 = vsel %vm405_vm4, 1.0, %v1202_v19  ;;  %v1050_v21 = vsel %vm404_vm5, 1.0, %v1202_v19  ;;  %v425_v37 = vmul.f32 %v1052_v30, %v1306_v17 }
  0x19   : > { %1115 = vmatprep.mubr.msk.f32.mxu0 %vm428_vm0, %v658_v10  ;;  %1122 = vmatprep.mubr.msk.f32.mxu1 %vm428_vm0, %v1070_v11  ;;  %v417_v22 = vmul.f32 %v1051_v20, %v414_v18  ;;  %v416_v23 = vmul.f32 %v1050_v21, %v414_v18 }
  0x1a   : > { %v635_v50 = vrot.slane %v425_v37, %v402_v14  ;;  %v519_v60 = vmul.f32 %v425_v37, %v382_v51 }
  0x1b   : > { %1116 = vmatmul.mubr.msk.f32.vlgmr.msra.gmra.mrb[2].mxu0 %vm428_vm0, %v659_v12  ;;  %1123 = vmatmul.mubr.msk.f32.vlgmr.msra.gmra.mrb[2].mxu1 %vm428_vm0, %v1071_v13 }
  0x1c   : > { %v637_v61 = vmul.f32 %v635_v50, %v382_v51 }
  0xea   : > { %v1103_v24 = vpop.f32.mrb[0].mxu0  ;;  %v1110_v25 = vpop.f32.mrb[0].mxu1 }
  0xeb   : > { %v511_v26 = vmul.f32 %v1103_v24, %v417_v22  ;;  %v623_v27 = vmul.f32 %v1110_v25, %v417_v22  ;;  %v501_v28 = vpop.f32.mrb[1].mxu0  ;;  %v613_v29 = vpop.f32.mrb[1].mxu1 }
  0xec   : > { %v510_v31 = vmul.f32 %v501_v28, %v416_v23  ;;  %v622_v32 = vmul.f32 %v613_v29, %v416_v23 }
  0xee   : > { %v512_v33 = vadd.f32 %v511_v26, %v510_v31  ;;  %v624_v34 = vadd.f32 %v623_v27, %v622_v32  ;;  %v1117_v35 = vpop.f32.mrb[2].mxu0  ;;  %v1124_v36 = vpop.f32.mrb[2].mxu1 }
  0xef   : > { %v742_v38 = vmul.f32 %v1117_v35, %v417_v22  ;;  %v855_v39 = vmul.f32 %v1124_v36, %v417_v22  ;;  %v732_v40 = vpop.f32.mrb[3].mxu0  ;;  %v845_v41 = vpop.f32.mrb[3].mxu1 }
  0xf0   : > { %v513_v42 = vrot.slane %v512_v33, 4  ;;  %v625_v43 = vrot.slane %v624_v34, 4  ;;  %v741_v44 = vmul.f32 %v732_v40, %v416_v23  ;;  %v854_v45 = vmul.f32 %v845_v41, %v416_v23 }
  0xf2   : > { %v514_v46 = vadd.f32 %v513_v42, %v512_v33  ;;  %v626_v47 = vadd.f32 %v625_v43, %v624_v34  ;;  %v743_v48 = vadd.f32 %v742_v38, %v741_v44  ;;  %v856_v49 = vadd.f32 %v855_v39, %v854_v45 }
  0xf3   : > { %v886_v42 = vsel %vm527_vm9, %v1306_v17, 0.0 }
  0xf4   : > { %v515_v52 = vrot.slane %v514_v46, 2  ;;  %v627_v53 = vrot.slane %v626_v47, 2  ;;  %v744_v54 = vrot.slane %v743_v48, 4  ;;  %v857_v55 = vrot.slane %v856_v49, 4 }
  0xf6   : > { %v516_v56 = vadd.f32 %v515_v52, %v514_v46  ;;  %v628_v57 = vadd.f32 %v627_v53, %v626_v47  ;;  %v745_v58 = vadd.f32 %v744_v54, %v743_v48  ;;  %v858_v59 = vadd.f32 %v857_v55, %v856_v49 }
  0xf8   : > { %v517_v62 = vrot.slane %v516_v56, 1  ;;  %v629_v63 = vrot.slane %v628_v57, 1  ;;  %v746_v1 = vrot.slane %v745_v58, 2  ;;  %v859_v2 = vrot.slane %v858_v59, 2 }
  0xfa   : > { %v518_v3 = vadd.f32 %v517_v62, %v516_v56  ;;  %v630_v4 = vadd.f32 %v629_v63, %v628_v57  ;;  %v747_v5 = vadd.f32 %v746_v1, %v745_v58  ;;  %v860_v6 = vadd.f32 %v859_v2, %v858_v59 }
  0xfc   : > { %v520_v7 = vsub.f32 %v518_v3, %v519_v60  ;;  %v638_v8 = vsub.f32 %v630_v4, %v637_v61  ;;  %v748_v9 = vrot.slane %v747_v5, 1  ;;  %v861_v10 = vrot.slane %v860_v6, 1 }
  0xfe   : > { %v639_v11 = vand.u32 2147483647, %v638_v8  ;;  %v749_v12 = vadd.f32 %v748_v9, %v747_v5  ;;  %v862_v13 = vadd.f32 %v861_v10, %v860_v6  ;;  %v521_v14 = vand.u32 2147483647, %v520_v7 }
 0x100   : > { %v750_v15 = vsub.f32 %v749_v12, %v637_v61  ;;  %v863_v16 = vsub.f32 %v862_v13, %v637_v61  ;;  %v524_v18 = vmul.f32 4.5, %v521_v14  ;;  %v642_v19 = vmul.f32 4.5, %v639_v11 }
 0x101   : > { %v1057_v22 = vadd.f32 -0.055555556, %v521_v14  ;;  %v1064_v24 = vadd.f32 -0.055555556, %v639_v11  ;;  %vm522_vm10 = vcmp.ge.f32.partialorder %v521_v14, 0.11111111 }
 0x102   : > { %v751_v20 = vand.u32 2147483647, %v750_v15  ;;  %v864_v21 = vand.u32 2147483647, %v863_v16  ;;  %v525_v23 = vmul.f32 %v524_v18, %v521_v14  ;;  %v643_v25 = vmul.f32 %v642_v19, %v639_v11 }
 0x103   : > { %vm640_vm11 = vcmp.ge.f32.partialorder %v639_v11, 0.11111111  ;;  %v898_v15 = vand.u32 127, %v384_v0 }
 0x104   : > { %v754_v26 = vmul.f32 4.5, %v751_v20  ;;  %v867_v27 = vmul.f32 4.5, %v864_v21  ;;  %v526_v28 = vsel %vm522_vm10, %v1057_v22, %v525_v23  ;;  %v644_v29 = vsel %vm640_vm11, %v1064_v24, %v643_v25 }
 0x105   : > { %v1069_v30 = vadd.f32 -0.055555556, %v751_v20  ;;  %v1076_v31 = vadd.f32 -0.055555556, %v864_v21  ;;  %v528_v32 = vsel %vm527_vm9, %v526_v28, 0.0  ;;  %v646_v33 = vrot.slane %v644_v29, 1 }
 0x106   : > { %v755_v34 = vmul.f32 %v754_v26, %v751_v20  ;;  %v868_v35 = vmul.f32 %v867_v27, %v864_v21  ;;  %529 = vadd.xlane.f32.xlu0 %v528_v32  ;;  %vm752_vm12 = vcmp.ge.f32.partialorder %v751_v20, 0.11111111  ;;  %vm865_vm13 = vcmp.ge.f32.partialorder %v864_v21, 0.11111111 }
 0x107   : > { %v648_v39 = vsel %vm527_vm9, %v646_v33, 0.0  ;;  %vm901_vm14 = vcmp.eq.s32.totalorder %v898_v15, 2  ;;  %vm900_vm15 = vcmp.eq.s32.totalorder %v898_v15, 1  ;;  %vm899_vm0 = vcmp.eq.s32.totalorder %v898_v15, 0 }
 0x108   : > { %v756_v36 = vsel %vm752_vm12, %v1069_v30, %v755_v34  ;;  %v869_v37 = vsel %vm865_vm13, %v1076_v31, %v868_v35 }
 0x109   : > { %v758_v38 = vrot.slane %v756_v36, 2  ;;  %v871_v41 = vrot.slane %v869_v37, 3 }
 0x10a   : > { %649 = vadd.xlane.f32.xlu0 %v648_v39 }
 0x10b   : > { %v760_v40 = vsel %vm527_vm9, %v758_v38, 0.0  ;;  %v873_v43 = vsel %vm527_vm9, %v871_v41, 0.0 }
 0x10c   : > { %761 = vadd.xlane.f32.xlu1 %v760_v40 }
 0x10e   : > { %887 = vadd.xlane.f32.xlu0 %v886_v42 }
 0x110   : > { %874 = vadd.xlane.f32.xlu1 %v873_v43 }
 0x193   : > { %v530_v44 = vpop.xlane.xlu0 %529 }
 0x194   : > { %v531_v45 = vrot.slane %v530_v44, 4 }
 0x196   : > { %v532_v46 = vadd.f32 %v531_v45, %v530_v44 }
 0x197   : > { %v650_v47 = vpop.xlane.xlu0 %649 }
 0x198   : > { %v533_v48 = vrot.slane %v532_v46, 2  ;;  %v651_v49 = vrot.slane %v650_v47, 4 }
 0x199   : > { %v762_v50 = vpop.xlane.xlu1 %761 }
 0x19a   : > { %v763_v51 = vrot.slane %v762_v50, 4  ;;  %v652_v52 = vadd.f32 %v651_v49, %v650_v47  ;;  %v534_v53 = vadd.f32 %v533_v48, %v532_v46 }
 0x19b   : > { %v888_v55 = vpop.xlane.xlu0 %887 }
 0x19c   : > { %v764_v54 = vadd.f32 %v763_v51, %v762_v50  ;;  %v653_v56 = vrot.slane %v652_v52, 2  ;;  %v889_v57 = vrot.slane %v888_v55, 4  ;;  %v535_v17 = vrot.slane %v534_v53, 1 }
 0x19d   : > { %v875_v58 = vpop.xlane.xlu1 %874 }
 0x19e   : > { %v765_v59 = vrot.slane %v764_v54, 2  ;;  %v876_v60 = vrot.slane %v875_v58, 4  ;;  %v890_v61 = vadd.f32 %v889_v57, %v888_v55  ;;  %v536_v62 = vadd.f32 %v535_v17, %v534_v53 }
 0x19f   : > { %v654_v63 = vadd.f32 %v653_v56, %v652_v52 }
 0x1a0   : > { %v877_v1 = vadd.f32 %v876_v60, %v875_v58  ;;  %v766_v2 = vadd.f32 %v765_v59, %v764_v54  ;;  %v891_v3 = vrot.slane %v890_v61, 2  ;;  %1141 = vpush %v536_v62 }
 0x1a1   : > { %v655_v4 = vrot.slane %v654_v63, 1 }
 0x1a2   : > { %v878_v5 = vrot.slane %v877_v1, 2  ;;  %v767_v6 = vrot.slane %v766_v2, 1  ;;  %v892_v7 = vadd.f32 %v891_v3, %v890_v61 }
 0x1a3   : > { %v656_v8 = vadd.f32 %v655_v4, %v654_v63 }
 0x1a4   : > { %v879_v9 = vadd.f32 %v878_v5, %v877_v1  ;;  %v768_v10 = vadd.f32 %v767_v6, %v766_v2  ;;  %v893_v11 = vrot.slane %v892_v7, 1 }
 0x1a5   : > { %1143 = vpush %v656_v8 }
 0x1a6   : > { %1145 = vpush %v768_v10  ;;  %v880_v12 = vrot.slane %v879_v9, 1  ;;  %v894_v14 = vadd.f32 %v893_v11, %v892_v7 }
 0x1a8   : > { %v881_v13 = vadd.f32 %v880_v12, %v879_v9 }
 0x1aa   : > { %1147 = vpush %v881_v13 }
 0x1ab   : > { %1149 = vpush %v894_v14 }
 0x1d1   : > { %s1142_s25 = spop %1141 }
 0x1d6   : > { %s1144_s26 = spop %1143 }
 0x1d7   : > { %s1146_s27 = spop %1145  ;;  %s883_s28 = sadd.f32 %s1144_s26, %s1142_s25 }
 0x1d9   : > { %v906_v20 = vstv %s883_s28 }
 0x1db   : > { %s1148_s29 = spop %1147 }
 0x1dc   : > { %s884_s30 = sadd.f32 %s1148_s29, %s1146_s27  ;;  %s1150_s7 = spop %1149 }
 0x1dd   : > { %v902_v16 = vstv %s1150_s7 }
 0x1de   : > { %v904_v18 = vstv %s884_s30  ;;  %v903_v19 = vsel %vm901_vm14, %v902_v16, 0.0 }
 0x1df   : > { %v905_v21 = vsel %vm900_vm15, %v904_v18, %v903_v19 }
 0x1e0   : > { %v907_v22 = vsel %vm899_vm0, %v906_v20, %v905_v21 }
 0x1e1   : > { %908 = vst [vmem:[%s378_s10] sm:$0x1] %v907_v22 }
 0x1e2 PF: > { %s16_s23 = sadd.s32 1, %s1199_s23   ;;  %s1343_s21 = smov %s1195_s22 }
 0x1e3   : > { %p13_p5 = scmp.ge.s32.totalorder %s16_s23, 4   ;;  %s1344_s22 = smov %s1346_s24 }
 0x1e5   :  { %15 = sbr.rel (!%p13_p5) target bundleno = 2 (0x2), region = 91 }

// kernel: centernet_loss.3
= control target key start
LH: loop header
LB: loop body
LE: loop exit
PB: predicated region body
PF: predicated region fallthrough
CT: control target
= control target key end

     0   :  { %10 = vsyncpa [#allocation3], 0  ;;  %s851_s0 = inlined_call_operand.vmem [shape: s32[2], index: 0, kind: input, shape index: {}]   ;;  %s852_s1 = inlined_call_operand.vmem [shape: s32[2,100], index: 1, kind: input, shape index: {}]   ;;  %s853_s2 = inlined_call_operand.vmem [shape: s32[2,100], index: 2, kind: input, shape index: {}]   ;;  %s854_s3 = inlined_call_operand.vmem [shape: s32[2,100], index: 3, kind: input, shape index: {}]   ;;  %s855_s4 = inlined_call_operand.vmem [shape: f32[2,100], index: 4, kind: input, shape index: {}]   ;;  %s856_s5 = inlined_call_operand.vmem [shape: f32[2,4,16,16], index: 5, kind: output, shape index: {}]  }
   0x1   :  { %11 = vsyncpa [#allocation5], 0 }
   0x2   :  { %12 = vsyncpa [#allocation8], 0  ;;  %s689_s18 = smov 0  }
   0x3 LB: > { %s178_s21 = sshll.u32 %s852_s1, 4  ;;  %s698_s22 = sadd.s32 4294967295, %s647_s18   ;;  %s647_s18 = sphi %s689_s18, %s18_s18   ;;  %s179_s21 = int_to_ptr.vmem [resolvable:$true] %s178_s21 }
   0x4   : > { %p454_p0 = scmp.ge.s32.totalorder %s647_s18, 1  ;;  %p154_p1 = scmp.lt.s32.totalorder %s647_s18, 3 }
   0x5   : > { %p857_p2 = scmp.eq.s32.totalorder %s698_s22, 0  ;;  %s200_s26 = sshll.u32 %s854_s3, 4  ;;  %s710_s26 = int_to_ptr.vmem [resolvable:$true] %s200_s26 }
   0x6   : > { %p703_p3 = pnand %p454_p0, %p154_p1  ;;  %s167_s29 = sshll.u32 %s851_s0, 4  ;;  %s717_s29 = int_to_ptr.vmem [resolvable:$true] %s167_s29 }
   0x7   : > { %s189_s8 = sshll.u32 %s853_s2, 4  ;;  %s211_s11 = sshll.u32 %s855_s4, 4  ;;  %s728_s8 = int_to_ptr.vmem [resolvable:$true] %s189_s8  ;;  %s212_s11 = int_to_ptr.vmem [resolvable:$true] %s211_s11 }
   0x8   : > { %p496_p4 = pneg %p703_p3  ;;  %s550_s12 = scalar_lea.vmem %s179_s21, 32 }
   0x9   : > { %p551_p6 = scmp.ne.s32.totalorder %s179_s21, %s550_s12  ;;  %p558_p10 = scmp.lt.s32.totalorder %s179_s21, %s179_s21 }
   0xa   : > { %p721_p5 = pnand %p857_p2, %p496_p4  ;;  %p559_p11 = scmp.lt.s32.totalorder %s550_s12, %s550_s12 }
   0xc   : > { %p735_p7 = pneg %p721_p5  ;;  %p560_p12 = por %p559_p11, %p558_p10 }
   0xe   : > { %p553_p8 = pnand %p735_p7, %p551_p6 }
  0x10   : > { %p554_p9 = pneg %p553_p8 }
  0x12   : > { %p561_p13 = pnand %p560_p12, %p554_p9 }
  0x14   : > { %564 = shalt.err (!%p561_p13)
}
  0x15   : > { %s653_s14 = smov [#allocation4]   ;;  %s565_s15 = scalar_lea.vmem %s710_s26, 32 }
  0x16   : > { %502 = dma.vmem_to_smem (!%p721_p5), %s179_s21, 32, %s653_s14, [#allocation5]  }
  0x17   : > { %p566_p0 = scmp.ne.s32.totalorder %s710_s26, %s565_s15  ;;  %p573_p6 = scmp.lt.s32.totalorder %s710_s26, %s710_s26 }
  0x18   : > { %p574_p8 = scmp.lt.s32.totalorder %s565_s15, %s565_s15 }
  0x19   : > { %p568_p1 = pnand %p566_p0, %p735_p7 }
  0x1a   : > { %p575_p2 = por %p574_p8, %p573_p6 }
  0x1b   : > { %p569_p4 = pneg %p568_p1 }
  0x1d   : > { %p576_p10 = pnand %p575_p2, %p569_p4 }
  0x1f   : > { %579 = shalt.err (!%p576_p10)
}
  0x20   : > { %s654_s16 = smov [#allocation7]   ;;  %s580_s17 = scalar_lea.vmem %s717_s29, 16 }
  0x21   : > { %508 = dma.vmem_to_smem (!%p721_p5), %s710_s26, 32, %s654_s16, [#allocation8]  }
  0x22   : > { %p581_p9 = scmp.ne.s32.totalorder %s717_s29, %s580_s17  ;;  %p588_p13 = scmp.lt.s32.totalorder %s717_s29, %s717_s29 }
  0x23   : > { %p589_p0 = scmp.lt.s32.totalorder %s580_s17, %s580_s17 }
  0x24   : > { %p583_p11 = pnand %p581_p9, %p735_p7 }
  0x25   : > { %p590_p1 = por %p589_p0, %p588_p13 }
  0x26   : > { %p584_p12 = pneg %p583_p11 }
  0x28   : > { %p591_p2 = pnand %p590_p1, %p584_p12 }
  0x2a   : > { %594 = shalt.err (!%p591_p2)
}
  0x2b   : > { %s655_s19 = smov [#allocation2]   ;;  %s595_s20 = scalar_lea.vmem %s728_s8, 32 }
  0x2c   : > { %499 = dma.vmem_to_smem (!%p721_p5), %s717_s29, 16, %s655_s19, [#allocation3]  }
  0x2d   : > { %p596_p4 = scmp.ne.s32.totalorder %s728_s8, %s595_s20  ;;  %p603_p10 = scmp.lt.s32.totalorder %s728_s8, %s728_s8 }
  0x2e   : > { %p604_p9 = scmp.lt.s32.totalorder %s595_s20, %s595_s20 }
  0x2f   : > { %p598_p6 = pnand %p596_p4, %p735_p7 }
  0x30   : > { %p605_p11 = por %p604_p9, %p603_p10 }
  0x31   : > { %p599_p8 = pneg %p598_p6 }
  0x33   : > { %p606_p12 = pnand %p605_p11, %p599_p8 }
  0x35   : > { %609 = shalt.err (!%p606_p12)
}
  0x36   : > { %s656_s21 = smov [#allocation6]   ;;  %s610_s26 = scalar_lea.vmem %s212_s11, 32 }
  0x37   : > { %505 = dma.vmem_to_smem (!%p721_p5), %s728_s8, 32, %s656_s21, [#allocation5]  }
  0x38   : > { %p611_p13 = scmp.ne.s32.totalorder %s212_s11, %s610_s26  ;;  %p618_p2 = scmp.lt.s32.totalorder %s212_s11, %s212_s11 }
  0x39   : > { %p619_p4 = scmp.lt.s32.totalorder %s610_s26, %s610_s26 }
  0x3a   : > { %p613_p0 = pnand %p611_p13, %p735_p7 }
  0x3b   : > { %p620_p6 = por %p619_p4, %p618_p2 }
  0x3c   : > { %p614_p1 = pneg %p613_p0 }
  0x3e   : > { %p621_p8 = pnand %p620_p6, %p614_p1 }
  0x40   : > { %624 = shalt.err (!%p621_p8)
}
  0x41   : > { %s657_s27 = smov [#allocation9]   ;;  %224 = sbr.rel (%p703_p3) target bundleno = 201 (0xc9), region = 40 }
  0x42   : > { %511 = dma.vmem_to_smem (!%p721_p5), %s212_s11, 32, %s657_s27, [#allocation8]  }
  0x43   : > { %p861_p10 = scmp.eq.s32.totalorder (!%p703_p3), %s698_s22, 0 }
  0x48   : > { %634 = dma.done.wait (%p861_p10), [#allocation3], 16   ;;  %p862_p9 = pmov %p861_p10 }
  0x4a   : > { %636 = vsyncadd (%p862_p9), [#allocation3], 4294967280  ;;  %p863_p7 = pmov %p862_p9 }
  0x4c   : > { %638 = dma.done.wait (%p863_p7), [#allocation5], 64   ;;  %p864_p11 = pmov %p863_p7 }
  0x4d   : > { %p865_p12 = pmov %p863_p7 }
  0x4e   : > { %640 = vsyncadd (%p864_p11), [#allocation5], 4294967232 }
  0x4f   : > { %642 = dma.done.wait (%p865_p12), [#allocation8], 64   ;;  %p866_p5 = pmov %p863_p7 }
  0x51   : > { %644 = vsyncadd (%p866_p5), [#allocation8], 4294967232 }
  0x52   : > { %246 = sfence }
  0x53   : > { %p264_p3 = scmp.lt.s32.totalorder %s698_s22, 1  ;;  %v278_v0 = vlaneseq  ;;  %s794_s23 = sld [smem:[#allocation2 + %s698_s22]]  ;;  %vm269_vm0 = vcmask 130048   ;;  %v658_v4 = vmov 0.0  }
  0x55   : > { %s265_s28 = scalar_select %p264_p3, %s698_s22, 1  ;;  %v797_v1 = vshrl.u32 %v278_v0, 7  ;;  %v799_v2 = vand.u32 127, %v278_v0 }
  0x57   : > { %s473_s29 = sshll.u32 %s265_s28, 6  ;;  %v802_v3 = vadd.s32 8, %v797_v1 }
  0x58   : > { %s807_s7 = scalar_lea.vmem %s856_s5, %s473_s29 }
  0x59   : > { %270 = vst.msk [vmem:[%s807_s7] sm:$0xff] %vm269_vm0, %v658_v4  ;;  %271 = vst.msk [vmem:[%s807_s7 + $0x8] sm:$0xff] %vm269_vm0, %v658_v4  ;;  %p468_p13 = scmp.le.s32.totalorder %s794_s23, 0 }
  0x5a   : > { %272 = vst.msk [vmem:[%s807_s7 + $0x10] sm:$0xff] %vm269_vm0, %v658_v4  ;;  %273 = vst.msk [vmem:[%s807_s7 + $0x18] sm:$0xff] %vm269_vm0, %v658_v4  ;;  %s826_s8 = smov (!%p468_p13), 0  }
  0x5b   : > { %274 = vst.msk [vmem:[%s807_s7 + $0x20] sm:$0xff] %vm269_vm0, %v658_v4  ;;  %275 = vst.msk [vmem:[%s807_s7 + $0x28] sm:$0xff] %vm269_vm0, %v658_v4  ;;  %390 = sbr.rel (%p468_p13) target bundleno = 201 (0xc9), region = 90 }
  0x5c   : > { %276 = vst.msk [vmem:[%s807_s7 + $0x30] sm:$0xff] %vm269_vm0, %v658_v4  ;;  %277 = vst.msk [vmem:[%s807_s7 + $0x38] sm:$0xff] %vm269_vm0, %v658_v4 }
  0x62 LB: >> { %s290_s9 = sshra.s32 %s651_s8, 7  ;;  %s295_s10 = sand.u32 127, %s651_s8  ;;  %s651_s8 = sphi %s826_s8, %s287_s8  }
  0x63   : >> { %s292_s11 = sadd.s32 %s698_s22, %s290_s9  ;;  %s287_s8 = sadd.s32 1, %s651_s8  }
  0x64   : >> { %s469_s12 = sshll.u32 %s292_s11, 7  ;;  %p286_p0 = scmp.ge.s32.totalorder %s287_s8, %s794_s23 }
  0x65   : >> { %s296_s13 = sadd.s32 %s469_s12, %s295_s10 }
  0x66   : >> { %s834_s14 = sld [smem:[#allocation9 + %s296_s13]] }
  0x67   : >> { %s297_s21 = sld [smem:[#allocation6 + %s296_s13]] }
  0x68   : >> { %s298_s24 = sld [smem:[#allocation7 + %s296_s13]] }
  0x69   : >> { %s299_s26 = sld [smem:[#allocation4 + %s296_s13]] }
  0x6c   : >> { %s309_s15 = smul.f32 2.0, %s834_s14  ;;  %v334_v29 = vstv %s834_s14 }
  0x6d   : >> { %v301_v7 = vstv %s297_s21 }
  0x6e   : >> { %s310_s16 = sadd.f32 1.0, %s309_s15  ;;  %v304_v8 = vstv %s298_s24  ;;  %v302_v9 = vsub.s32 %v799_v2, %v301_v7 }
  0x6f   : >> { %v305_v10 = vsub.s32 %v797_v1, %v304_v8  ;;  %v306_v11 = vsub.s32 %v802_v3, %v304_v8  ;;  %s470_s27 = sshll.u32 %s299_s26, 4 }
  0x70   : >> { %s313_s17 = smul.f32 0.16666667, %s310_s16  ;;  %v303_v12 = vcvt.s32.f32 %v302_v9  ;;  %s345_s28 = scalar_lea.vmem %s807_s7, %s470_s27 }
  0x71   : >> { %v307_v13 = vcvt.s32.f32 %v305_v10  ;;  %v308_v14 = vcvt.s32.f32 %v306_v11  ;;  %v346_v31 = vld [vmem:[%s345_s28] sm:$0xff]  ;;  %v347_v33 = vld [vmem:[%s345_s28 + $0x8] sm:$0xff] }
  0x72   : >> { %s314_s19 = smul.f32 2.0, %s313_s17  ;;  %v319_v15 = vmul.f32 %v303_v12, %v303_v12  ;;  %v333_v27 = vand.u32 2147483647, %v303_v12 }
  0x73   : >> { %v320_v16 = vmul.f32 %v307_v13, %v307_v13  ;;  %v321_v17 = vmul.f32 %v308_v14, %v308_v14  ;;  %v336_v28 = vand.u32 2147483647, %v307_v13  ;;  %v337_v30 = vand.u32 2147483647, %v308_v14 }
  0x74   : >> { %s315_s20 = smul.f32 %s314_s19, %s313_s17  ;;  %vm335_vm1 = vcmp.le.f32.partialorder %v333_v27, %v334_v29 }
  0x75   : >> { %v322_v18 = vadd.f32 %v320_v16, %v319_v15  ;;  %v323_v19 = vadd.f32 %v321_v17, %v319_v15  ;;  %vm338_vm2 = vcmp.le.f32.partialorder %v336_v28, %v334_v29  ;;  %vm339_vm3 = vcmp.le.f32.partialorder %v337_v30, %v334_v29 }
  0x76   : >> { %v316_v5 = vstv %s315_s20  ;;  %vm340_vm4 = vmand %vm335_vm1, %vm338_vm2 }
  0x77   : >> { %544 = vrcp.f32 %v316_v5  ;;  %v324_v20 = vsub.f32 0.0, %v322_v18  ;;  %v325_v21 = vsub.f32 0.0, %v323_v19  ;;  %vm341_vm5 = vmand %vm335_vm1, %vm339_vm3 }
  0x81   : >> { %v545_v6 = vpop.eup %544 }
  0x82   : >> { %474 = vpush %v545_v6 }
  0xb3   : >> { %s475_s25 = spop %474 }
  0xb4   : >> { %v326_v22 = vstv %s475_s25 }
  0xb5   : >> { %v327_v23 = vmul.f32 %v326_v22, %v324_v20  ;;  %v328_v24 = vmul.f32 %v326_v22, %v325_v21 }
  0xb7   : >> { %v329_v25 = vmul.f32 1.442695, %v327_v23  ;;  %v331_v26 = vmul.f32 1.442695, %v328_v24 }
  0xb9   : >> { %546 = vpow2.f32 %v329_v25 }
  0xba   : >> { %548 = vpow2.f32 %v331_v26 }
  0xc2   : > { %289 = sbr.rel (!%p286_p0) target bundleno = 98 (0x62), region = 96 }
  0xc3   : >> { %v547_v32 = vpop.eup %546 }
  0xc4   : >> { %v549_v34 = vpop.eup %548  ;;  %v342_v35 = vsel %vm340_vm4, %v547_v32, 0.0 }
  0xc5   : >> { %v343_v36 = vsel %vm341_vm5, %v549_v34, 0.0  ;;  %v348_v37 = vmax.f32 %v346_v31, %v342_v35 }
  0xc6   : >> { %v349_v38 = vmax.f32 %v347_v33, %v343_v36 }
  0xc7   : >> { %350 = vst.msk [vmem:[%s345_s28] sm:$0xff] %vm269_vm0, %v348_v37 }
  0xc8   : >> { %351 = vst.msk [vmem:[%s345_s28 + $0x8] sm:$0xff] %vm269_vm0, %v349_v38 }
  0xc9 PF: > { %s18_s18 = sadd.s32 1, %s647_s18  }
  0xca   : > { %p15_p1 = scmp.ge.s32.totalorder %s18_s18, 4  }
  0xcc   :  { %17 = sbr.rel (!%p15_p1) target bundleno = 3 (0x3), region = 107 }
  0xd3   :  { %373 = vsyncpa [#allocation3], 1 }
  0xd4   :  { %375 = vsyncpa [#allocation3 + $0x1], 1 }
  0xd5   :  { %376 = vsyncpa [#allocation5], 1 }
  0xd6   :  { %377 = vsyncpa [#allocation8], 1 }

// kernel: centernet_loss.4
= control target key start
LH: loop header
LB: loop body
LE: loop exit
PB: predicated region body
PF: predicated region fallthrough
CT: control target
= control target key end

     0   :  { %v94_v32 = vmov 0.0   ;;  %v70_v51 = vlaneseq  ;;  %s131_s0 = inlined_call_operand.vmem [shape: f32[8,256], index: 0, kind: input, shape index: {}]   ;;  %s132_s1 = inlined_call_operand.vmem [shape: f32[8,256], index: 1, kind: input, shape index: {}]   ;;  %s133_s2 = inlined_call_operand.vmem [shape: f32[1,1,128], index: 2, kind: output, shape index: {}]  }
   0x1   :  { %v11_v0 = vld [vmem:[%s131_s0] sm:$0xff]  ;;  %v12_v1 = vld [vmem:[%s131_s0 + $0x8] sm:$0xff] }
   0x2   :  { %v13_v2 = vmax.f32 %v11_v0, 0.0001  ;;  %v14_v3 = vmax.f32 %v12_v1, 0.0001  ;;  %v17_v4 = vld [vmem:[%s132_s1] sm:$0xff]  ;;  %v18_v5 = vld [vmem:[%s132_s1 + $0x8] sm:$0xff] }
   0x3   :  { %v29_v6 = vsub.f32 1.0, %v17_v4  ;;  %v30_v9 = vsub.f32 1.0, %v18_v5  ;;  %vm19_vm0 = vcmp.eq.f32.partialorder %v17_v4, 1.0  ;;  %vm20_vm1 = vcmp.eq.f32.partialorder %v18_v5, 1.0 }
   0x4   :  { %v15_v7 = vmin.f32 %v13_v2, 0.9999  ;;  %v16_v8 = vmin.f32 %v14_v3, 0.9999  ;;  %v83_v33 = vsel %vm19_vm0, 1.0, %v94_v32  ;;  %v84_v34 = vsel %vm20_vm1, 1.0, %v94_v32 }
   0x5   :  { %v31_v12 = vmul.f32 %v29_v6, %v29_v6  ;;  %v32_v15 = vmul.f32 %v30_v9, %v30_v9  ;;  %v60_v36 = vadd.f32 %v84_v34, %v83_v33  ;;  %v71_v52 = vand.u32 127, %v70_v51 }
   0x6   :  { %v21_v10 = vsub.f32 1.0, %v15_v7  ;;  %v22_v11 = vsub.f32 1.0, %v16_v8  ;;  %v35_v16 = vmul.f32 %v15_v7, %v15_v7  ;;  %v36_v18 = vmul.f32 %v16_v8, %v16_v8 }
   0x7   :  { %v37_v17 = vmul.f32 %v31_v12, %v31_v12  ;;  %v38_v19 = vmul.f32 %v32_v15, %v32_v15  ;;  %vm73_vm2 = vcmp.eq.s32.totalorder %v71_v52, 1  ;;  %vm72_vm3 = vcmp.eq.s32.totalorder %v71_v52, 0 }
   0x8   :  { %v23_v13 = vsel %vm19_vm0, %v15_v7, %v21_v10  ;;  %v24_v14 = vsel %vm20_vm1, %v16_v8, %v22_v11  ;;  %v33_v20 = vmul.f32 %v21_v10, %v21_v10  ;;  %v34_v22 = vmul.f32 %v22_v11, %v22_v11 }
   0x9   :  { %90 = vlog2.f32 %v23_v13  ;;  %v39_v21 = vmul.f32 %v37_v17, %v35_v16  ;;  %v40_v23 = vmul.f32 %v38_v19, %v36_v18 }
   0xa   :  { %92 = vlog2.f32 %v24_v14 }
   0xb   :  { %v41_v25 = vsel %vm19_vm0, %v33_v20, %v39_v21  ;;  %v42_v28 = vsel %vm20_vm1, %v34_v22, %v40_v23 }
  0x13   :  { %v91_v24 = vpop.eup %90 }
  0x14   :  { %v93_v26 = vpop.eup %92  ;;  %v26_v27 = vmul.f32 0.6931472, %v91_v24 }
  0x15   :  { %v28_v29 = vmul.f32 0.6931472, %v93_v26 }
  0x16   :  { %v43_v30 = vmul.f32 %v41_v25, %v26_v27 }
  0x17   :  { %v44_v31 = vmul.f32 %v42_v28, %v28_v29 }
  0x19   :  { %v45_v35 = vadd.f32 %v44_v31, %v43_v30 }
  0x1b   :  { %46 = vadd.xlane.f32.xlu0 %v45_v35 }
  0x1f   :  { %61 = vadd.xlane.f32.xlu0 %v60_v36 }
  0xa8   :  { %v47_v37 = vpop.xlane.xlu0 %46 }
  0xa9   :  { %v48_v38 = vrot.slane %v47_v37, 4 }
  0xab   :  { %v49_v39 = vadd.f32 %v48_v38, %v47_v37 }
  0xac   :  { %v62_v40 = vpop.xlane.xlu0 %61 }
  0xad   :  { %v50_v41 = vrot.slane %v49_v39, 2  ;;  %v63_v42 = vrot.slane %v62_v40, 4 }
  0xaf   :  { %v64_v43 = vadd.f32 %v63_v42, %v62_v40  ;;  %v51_v44 = vadd.f32 %v50_v41, %v49_v39 }
  0xb1   :  { %v65_v45 = vrot.slane %v64_v43, 2  ;;  %v52_v46 = vrot.slane %v51_v44, 1 }
  0xb3   :  { %v66_v47 = vadd.f32 %v65_v45, %v64_v43  ;;  %v53_v48 = vadd.f32 %v52_v46, %v51_v44 }
  0xb5   :  { %85 = vpush %v53_v48  ;;  %v67_v49 = vrot.slane %v66_v47, 1 }
  0xb7   :  { %v68_v50 = vadd.f32 %v67_v49, %v66_v47 }
  0xb9   :  { %87 = vpush %v68_v50 }
  0xe6   :  { %s86_s0 = spop %85 }
  0xe7   :  { %s55_s1 = ssub.f32 0.0, %s86_s0 }
  0xe9   :  { %v76_v54 = vstv %s55_s1 }
  0xea   :  { %s88_s17 = spop %87 }
  0xeb   :  { %v74_v53 = vstv %s88_s17 }
  0xec   :  { %v75_v55 = vsel %vm73_vm2, %v74_v53, 0.0 }
  0xed   :  { %v77_v56 = vsel %vm72_vm3, %v76_v54, %v75_v55 }
  0xee   :  { %78 = vst [vmem:[%s133_s2] sm:$0x1] %v77_v56 }

</bundles_post_ra>
